<compile_context>
chip_gen: v6e
topology: v6e:2x2x1
jax: 0.10.0
libtpu: 0.0.40
codegen_flags: <defaults>
</compile_context>

<pallas_src>
import functools

import jax
import jax.numpy as jnp
from jax.experimental import pallas as pl
from jax.experimental.pallas import tpu as pltpu


def _round_up(x, m):
    return ((x + m - 1) // m) * m


def _vmem_capacity_bytes():
    """Generation-aware VMEM capacity (64 MiB on v7x, 128 MiB on v5e/v6e)."""
    try:
        return int(pltpu.get_tpu_info().vmem_capacity_bytes)
    except Exception:
        return 64 << 20  # conservative (v7x) default


# ---------------------------------------------------------------------------
# Fused path: im2col + matmul inside the kernel (stride == 1).
# ---------------------------------------------------------------------------
def _fused_conv_kernel(x_ref, w_ref, b_ref, o_ref, *, kH, kW, dilation,
                       H_out, W_out):
    """One zero-padded image plane -> one output plane.

    x_ref: (Hp, Wp, C_in)         padded input plane (compute dtype)
    w_ref: (kH*kW, C_in, C_out)   pre-masked weight, tap-major (compute dtype)
    b_ref: (1, C_out)             bias, f32
    o_ref: (H_out*W_out, C_out)   output plane, f32
    """
    C_in = x_ref.shape[-1]
    C_out = w_ref.shape[-1]
    P = H_out * W_out
    acc = jnp.zeros((P, C_out), jnp.float32)
    for t in range(kH * kW):                     # static unroll over taps
        i, j = divmod(t, kW)
        hi = i * dilation
        wj = j * dilation
        slab = x_ref[hi:hi + H_out, wj:wj + W_out, :]   # (H_out, W_out, C_in)
        acc = acc + jnp.dot(slab.reshape(P, C_in), w_ref[t],
                            preferred_element_type=jnp.float32)
    o_ref[...] = (acc + b_ref[...]).astype(o_ref.dtype)


def _masked_conv2d_fused(x, w_masked, bias, *, padding, dilation,
                         compute_dtype, vmem_cap):
    N, C_in, H, W = x.shape
    C_out, _, kH, kW = w_masked.shape
    Hp, Wp = H + 2 * padding, W + 2 * padding
    H_out = Hp - (kH - 1) * dilation
    W_out = Wp - (kW - 1) * dilation
    P = H_out * W_out

    cdt = jnp.dtype(compute_dtype)
    x_nhwc = jnp.transpose(x, (0, 2, 3, 1)).astype(cdt)
    x_nhwc = jnp.pad(
        x_nhwc, ((0, 0), (padding, padding), (padding, padding), (0, 0)))
    # Tap-major weight: w_taps[i*kW + j] == w_masked[:, :, i, j].T -> (C_in, C_out)
    w_taps = (w_masked.transpose(2, 3, 1, 0)
              .reshape(kH * kW, C_in, C_out).astype(cdt))
    b_row = bias.reshape(1, C_out).astype(jnp.float32)

    item = cdt.itemsize
    step_bytes = (2 * Hp * Wp * C_in * item        # double-buffered x plane
                  + 2 * P * C_out * 4              # double-buffered out plane
                  + 2 * kH * kW * C_in * C_out * item  # weight buffers
                  + 2 * P * C_out * 4)             # accumulator spill headroom
    vmem_limit = int(min(0.75 * vmem_cap, step_bytes + (8 << 20)))

    cost = pl.CostEstimate(
        flops=2 * N * P * kH * kW * C_in * C_out,
        transcendentals=0,
        bytes_accessed=(N * Hp * Wp * C_in * item
                        + kH * kW * C_in * C_out * item
                        + C_out * 4
                        + N * P * C_out * 4),
    )

    kernel = functools.partial(_fused_conv_kernel, kH=kH, kW=kW,
                               dilation=dilation, H_out=H_out, W_out=W_out)
    out = pl.pallas_call(
        kernel,
        out_shape=jax.ShapeDtypeStruct((N, P, C_out), jnp.float32),
        grid_spec=pltpu.PrefetchScalarGridSpec(
            num_scalar_prefetch=0,
            grid=(N,),
            in_specs=[
                pl.BlockSpec((None, Hp, Wp, C_in), lambda n: (n, 0, 0, 0)),
                # Grid-invariant weight / bias: constant index_map keeps them
                # VMEM-resident across the whole grid (never re-fetched).
                pl.BlockSpec((kH * kW, C_in, C_out), lambda n: (0, 0, 0)),
                pl.BlockSpec((1, C_out), lambda n: (0, 0)),
            ],
            out_specs=pl.BlockSpec((None, P, C_out), lambda n: (n, 0, 0)),
        ),
        compiler_params=pltpu.CompilerParams(
            dimension_semantics=("parallel",),     # megacore / v7x dual-TC
            vmem_limit_bytes=vmem_limit,
        ),
        cost_estimate=cost,
    )(x_nhwc, w_taps, b_row)

    return out.reshape(N, H_out, W_out, C_out)


# ---------------------------------------------------------------------------
# Fallback path: wrapper-side im2col + matmul kernel (general stride, large
# planes).  Kept from v2 but with K-scaled TM, bf16 inputs, unpadded C_out.
# ---------------------------------------------------------------------------
def _im2col_matmul_kernel(p_ref, w_ref, b_ref, o_ref):
    o_ref[...] = (jnp.dot(p_ref[...], w_ref[...],
                          preferred_element_type=jnp.float32)
                  + b_ref[...]).astype(o_ref.dtype)


def _im2col_nhwc(x_nhwc, kH, kW, stride, dilation):
    """x_nhwc (N, Hp, Wp, C) already padded -> patches (N*H_out*W_out, kH*kW*C)."""
    N, Hp, Wp, C = x_nhwc.shape
    H_out = (Hp - (kH - 1) * dilation - 1) // stride + 1
    W_out = (Wp - (kW - 1) * dilation - 1) // stride + 1
    taps = []
    for i in range(kH):
        for j in range(kW):
            hi, wj = i * dilation, j * dilation
            taps.append(x_nhwc[:, hi:hi + (H_out - 1) * stride + 1:stride,
                               wj:wj + (W_out - 1) * stride + 1:stride, :])
    patches = jnp.stack(taps, axis=3)          # (N, H_out, W_out, kH*kW, C)
    return patches.reshape(N * H_out * W_out, kH * kW * C), H_out, W_out


def _masked_conv2d_im2col(x, w_masked, bias, *, stride, padding, dilation,
                          compute_dtype, vmem_cap):
    N, C_in, H, W = x.shape
    C_out, _, kH, kW = w_masked.shape
    K = C_in * kH * kW
    cdt = jnp.dtype(compute_dtype)

    w_flat = w_masked.transpose(2, 3, 1, 0).reshape(K, C_out).astype(cdt)
    b_row = bias.reshape(1, C_out).astype(jnp.float32)

    x_nhwc = jnp.transpose(x, (0, 2, 3, 1)).astype(cdt)
    x_nhwc = jnp.pad(
        x_nhwc, ((0, 0), (padding, padding), (padding, padding), (0, 0)))
    patches, H_out, W_out = _im2col_nhwc(x_nhwc, kH, kW, stride, dilation)
    M = patches.shape[0]

    item = cdt.itemsize
    # K-scaled TM: ~2 MiB patches buffer, clamped [512, 4096], >= 2 grid steps
    # so both v7x TensorCores get work, never larger than (padded) M.
    tm = (2 << 20) // (item * max(K, 128))
    tm = max(512, min(4096, tm))
    tm = min(tm, _round_up(pl.cdiv(M, 2), 8), _round_up(M, 8))
    tm = max(8, (tm // 8) * 8)
    grid_m = pl.cdiv(M, tm)

    step_bytes = 2 * tm * (K * item + C_out * 4) + 2 * C_out * (K * item + 4)
    vmem_limit = int(min(0.75 * vmem_cap, step_bytes + (8 << 20)))

    cost = pl.CostEstimate(
        flops=2 * M * K * C_out,
        transcendentals=0,
        bytes_accessed=(M * K * item + K * C_out * item + C_out * 4
                        + M * C_out * 4),
    )

    out = pl.pallas_call(
        _im2col_matmul_kernel,
        out_shape=jax.ShapeDtypeStruct((M, C_out), jnp.float32),
        grid_spec=pltpu.PrefetchScalarGridSpec(
            num_scalar_prefetch=0,
            grid=(grid_m,),
            in_specs=[
                pl.BlockSpec((tm, K), lambda i: (i, 0)),
                pl.BlockSpec((K, C_out), lambda i: (0, 0)),
                pl.BlockSpec((1, C_out), lambda i: (0, 0)),
            ],
            out_specs=pl.BlockSpec((tm, C_out), lambda i: (i, 0)),
        ),
        compiler_params=pltpu.CompilerParams(
            dimension_semantics=("parallel",),
            vmem_limit_bytes=vmem_limit,
        ),
        cost_estimate=cost,
    )(patches, w_flat, b_row)

    return out.reshape(N, H_out, W_out, C_out)


# ---------------------------------------------------------------------------
# Public entry point.
# ---------------------------------------------------------------------------
@functools.partial(jax.jit, static_argnames=("stride", "padding", "dilation",
                                             "groups", "compute_dtype"))
def masked_conv2d(x, weight, mask, bias=None, *, stride=1, padding=0,
                  dilation=1, groups=1, compute_dtype=jnp.bfloat16):
    """Masked 2-D convolution (PixelCNN).

    x:      (N, C_in, H, W)        float32, NCHW
    weight: (C_out, C_in, kH, kW)  float32
    mask:   (C_in, kH, kW)         float32/0-1 (broadcast over C_out)
    bias:   (C_out,) or None
    returns (N, C_out, H_out, W_out) float32
    """
    assert groups == 1, "groups > 1 not supported"
    N, C_in, H, W = x.shape
    C_out, C_in_w, kH, kW = weight.shape
    assert C_in_w == C_in
    assert mask.shape == (C_in, kH, kW)
    if bias is None:
        bias = jnp.zeros((C_out,), jnp.float32)

    # Mask the weight exactly once, in f32 (mask is 0/1 so this stays exact
    # regardless of the compute dtype the masked weight is later cast to).
    w_masked = (weight * mask[None, :, :, :]).astype(jnp.float32)

    vmem_cap = _vmem_capacity_bytes()
    Hp, Wp = H + 2 * padding, W + 2 * padding
    item = jnp.dtype(compute_dtype).itemsize

    use_fused = False
    if stride == 1:
        H_out = Hp - (kH - 1) * dilation
        W_out = Wp - (kW - 1) * dilation
        P = H_out * W_out
        step_bytes = (2 * Hp * Wp * C_in * item + 4 * P * C_out * 4
                      + 2 * kH * kW * C_in * C_out * item)
        # W_out % 8 == 0 keeps the in-kernel (H_out, W_out, C) -> (P, C)
        # collapse a pure re-tiling (no cross-sublane relayout).
        use_fused = (H_out > 0 and W_out > 0 and W_out % 8 == 0
                     and step_bytes <= 0.6 * vmem_cap)

    if use_fused:
        out_nhwc = _masked_conv2d_fused(
            x, w_masked, bias, padding=padding, dilation=dilation,
            compute_dtype=compute_dtype, vmem_cap=vmem_cap)
    else:
        out_nhwc = _masked_conv2d_im2col(
            x, w_masked, bias, stride=stride, padding=padding,
            dilation=dilation, compute_dtype=compute_dtype, vmem_cap=vmem_cap)

    # Single NHWC -> NCHW transpose at the true API boundary.
    return jnp.transpose(out_nhwc, (0, 3, 1, 2))


def _reference_conv(x, weight, mask, bias, *, stride, padding, dilation):
    """Plain-JAX reference (lax conv) for a sanity check."""
    w_masked = weight * mask[None, :, :, :]
    out = jax.lax.conv_general_dilated(
        x, w_masked,
        window_strides=(stride, stride),
        padding=((padding, padding), (padding, padding)),
        rhs_dilation=(dilation, dilation),
        dimension_numbers=("NCHW", "OIHW", "NCHW"))
    return out + bias.reshape(1, -1, 1, 1)


if __name__ == "__main__":
    key = jax.random.PRNGKey(0)
    kx, kw, kb = jax.random.split(key, 3)

    # Small, module-consistent shapes.
    N, C_in, H, W = 2, 4, 16, 16
    C_out, kH, kW_ = 8, 3, 3

    x = jax.random.normal(kx, (N, C_in, H, W), dtype=jnp.float32)
    weight = jax.random.normal(kw, (C_out, C_in, kH, kW_),
                               dtype=jnp.float32) * 0.1
    bias = jax.random.normal(kb, (C_out,), dtype=jnp.float32) * 0.1

    # Deterministic PixelCNN-style type-A causal mask, shape (C_in, kH, kW):
    # rows strictly above center + columns strictly left of center on the
    # center row; zero elsewhere.
    mask2d = jnp.zeros((kH, kW_), dtype=jnp.float32)
    mask2d = mask2d.at[:kH // 2, :].set(1.0)
    mask2d = mask2d.at[kH // 2, :kW_ // 2].set(1.0)
    mask = jnp.broadcast_to(mask2d, (C_in, kH, kW_))

    checks = [
        # (stride, padding, dilation, compute_dtype, tol)
        (1, 1, 1, jnp.float32, 1e-4),    # fused path, f32 exactness
        (1, 1, 1, jnp.bfloat16, 2e-2),   # fused path, bf16 inputs / f32 acc
        (2, 1, 1, jnp.float32, 1e-4),    # im2col fallback path (stride != 1)
    ]
    for stride, padding, dilation, cdt, tol in checks:
        y = masked_conv2d(x, weight, mask, bias, stride=stride,
                          padding=padding, dilation=dilation,
                          compute_dtype=cdt)
        y = jax.block_until_ready(y)
        y_ref = _reference_conv(x, weight, mask, bias, stride=stride,
                                padding=padding, dilation=dilation)
        assert y.shape == y_ref.shape, (y.shape, y_ref.shape)
        err = float(jnp.max(jnp.abs(y - y_ref)))
        assert jnp.allclose(y, y_ref, rtol=tol, atol=tol), (stride, cdt, err)

    print("KERNEL_OK")
</pallas_src>

<mosaic_0001>
module attributes {stable_mosaic.version = 11 : i64} {
  func.func @_fused_conv_kernel(%arg0: i32, %arg1: memref<1x18x18x4xf32, #tpu.memory_space<vmem>>, %arg2: memref<9x4x8xf32, #tpu.memory_space<vmem>>, %arg3: memref<1x8xf32, #tpu.memory_space<vmem>>, %arg4: memref<1x256x8xf32, #tpu.memory_space<vmem>>) attributes {dimension_semantics = [#tpu.dimension_semantics<parallel>], iteration_bounds = array<i64: 2>, scalar_prefetch = 0 : i64, scratch_operands = 0 : i64, tpu.core_type = #tpu.core_type<tc>, window_params = [{transform_indices = @transform_0, window_bounds = array<i64: 1, 18, 18, 4>}, {pipeline_mode = #tpu.pipeline_mode<synchronous>, transform_indices = @transform_1, window_bounds = array<i64: 9, 4, 8>}, {pipeline_mode = #tpu.pipeline_mode<synchronous>, transform_indices = @transform_2, window_bounds = array<i64: 1, 8>}, {transform_indices = @transform_3, window_bounds = array<i64: 1, 256, 8>}]} {
    %cst = arith.constant 0.000000e+00 : f32
    %0 = vector.broadcast %cst : f32 to vector<256x8xf32>
    %c0 = arith.constant 0 : index
    %c0_0 = arith.constant 0 : index
    %c0_1 = arith.constant 0 : index
    %c0_2 = arith.constant 0 : index
    %1 = vector.load %arg1[%c0, %c0_0, %c0_1, %c0_2] : memref<1x18x18x4xf32, #tpu.memory_space<vmem>>, vector<1x16x16x4xf32>
    %2 = vector.shape_cast %1 : vector<1x16x16x4xf32> to vector<16x16x4xf32>
    %3 = vector.shape_cast %2 : vector<16x16x4xf32> to vector<256x4xf32>
    %c0_3 = arith.constant 0 : index
    %c0_4 = arith.constant 0 : index
    %c0_5 = arith.constant 0 : index
    %4 = vector.load %arg2[%c0_3, %c0_4, %c0_5] : memref<9x4x8xf32, #tpu.memory_space<vmem>>, vector<1x4x8xf32>
    %5 = vector.shape_cast %4 : vector<1x4x8xf32> to vector<4x8xf32>
    %cst_6 = arith.constant dense<0.000000e+00> : vector<256x8xf32>
    %6 = tpu.matmul %3, %5, %cst_6 {dimension_numbers = #tpu.dot_dimension_numbers<[1], [0], [0], [1], [0, 0, 1, 1], [], []>} : vector<256x4xf32>, vector<4x8xf32>, vector<256x8xf32> -> vector<256x8xf32>
    %7 = arith.addf %0, %6 : vector<256x8xf32>
    %c0_7 = arith.constant 0 : index
    %c0_8 = arith.constant 0 : index
    %c1 = arith.constant 1 : index
    %c0_9 = arith.constant 0 : index
    %8 = vector.load %arg1[%c0_7, %c0_8, %c1, %c0_9] : memref<1x18x18x4xf32, #tpu.memory_space<vmem>>, vector<1x16x16x4xf32>
    %9 = vector.shape_cast %8 : vector<1x16x16x4xf32> to vector<16x16x4xf32>
    %10 = vector.shape_cast %9 : vector<16x16x4xf32> to vector<256x4xf32>
    %c1_10 = arith.constant 1 : index
    %c0_11 = arith.constant 0 : index
    %c0_12 = arith.constant 0 : index
    %11 = vector.load %arg2[%c1_10, %c0_11, %c0_12] : memref<9x4x8xf32, #tpu.memory_space<vmem>>, vector<1x4x8xf32>
    %12 = vector.shape_cast %11 : vector<1x4x8xf32> to vector<4x8xf32>
    %cst_13 = arith.constant dense<0.000000e+00> : vector<256x8xf32>
    %13 = tpu.matmul %10, %12, %cst_13 {dimension_numbers = #tpu.dot_dimension_numbers<[1], [0], [0], [1], [0, 0, 1, 1], [], []>} : vector<256x4xf32>, vector<4x8xf32>, vector<256x8xf32> -> vector<256x8xf32>
    %14 = arith.addf %7, %13 : vector<256x8xf32>
    %c0_14 = arith.constant 0 : index
    %c0_15 = arith.constant 0 : index
    %c2 = arith.constant 2 : index
    %c0_16 = arith.constant 0 : index
    %15 = vector.load %arg1[%c0_14, %c0_15, %c2, %c0_16] : memref<1x18x18x4xf32, #tpu.memory_space<vmem>>, vector<1x16x16x4xf32>
    %16 = vector.shape_cast %15 : vector<1x16x16x4xf32> to vector<16x16x4xf32>
    %17 = vector.shape_cast %16 : vector<16x16x4xf32> to vector<256x4xf32>
    %c2_17 = arith.constant 2 : index
    %c0_18 = arith.constant 0 : index
    %c0_19 = arith.constant 0 : index
    %18 = vector.load %arg2[%c2_17, %c0_18, %c0_19] : memref<9x4x8xf32, #tpu.memory_space<vmem>>, vector<1x4x8xf32>
    %19 = vector.shape_cast %18 : vector<1x4x8xf32> to vector<4x8xf32>
    %cst_20 = arith.constant dense<0.000000e+00> : vector<256x8xf32>
    %20 = tpu.matmul %17, %19, %cst_20 {dimension_numbers = #tpu.dot_dimension_numbers<[1], [0], [0], [1], [0, 0, 1, 1], [], []>} : vector<256x4xf32>, vector<4x8xf32>, vector<256x8xf32> -> vector<256x8xf32>
    %21 = arith.addf %14, %20 : vector<256x8xf32>
    %c0_21 = arith.constant 0 : index
    %c1_22 = arith.constant 1 : index
    %c0_23 = arith.constant 0 : index
    %c0_24 = arith.constant 0 : index
    %22 = vector.load %arg1[%c0_21, %c1_22, %c0_23, %c0_24] : memref<1x18x18x4xf32, #tpu.memory_space<vmem>>, vector<1x16x16x4xf32>
    %23 = vector.shape_cast %22 : vector<1x16x16x4xf32> to vector<16x16x4xf32>
    %24 = vector.shape_cast %23 : vector<16x16x4xf32> to vector<256x4xf32>
    %c3 = arith.constant 3 : index
    %c0_25 = arith.constant 0 : index
    %c0_26 = arith.constant 0 : index
    %25 = vector.load %arg2[%c3, %c0_25, %c0_26] : memref<9x4x8xf32, #tpu.memory_space<vmem>>, vector<1x4x8xf32>
    %26 = vector.shape_cast %25 : vector<1x4x8xf32> to vector<4x8xf32>
    %cst_27 = arith.constant dense<0.000000e+00> : vector<256x8xf32>
    %27 = tpu.matmul %24, %26, %cst_27 {dimension_numbers = #tpu.dot_dimension_numbers<[1], [0], [0], [1], [0, 0, 1, 1], [], []>} : vector<256x4xf32>, vector<4x8xf32>, vector<256x8xf32> -> vector<256x8xf32>
    %28 = arith.addf %21, %27 : vector<256x8xf32>
    %c0_28 = arith.constant 0 : index
    %c1_29 = arith.constant 1 : index
    %c1_30 = arith.constant 1 : index
    %c0_31 = arith.constant 0 : index
    %29 = vector.load %arg1[%c0_28, %c1_29, %c1_30, %c0_31] : memref<1x18x18x4xf32, #tpu.memory_space<vmem>>, vector<1x16x16x4xf32>
    %30 = vector.shape_cast %29 : vector<1x16x16x4xf32> to vector<16x16x4xf32>
    %31 = vector.shape_cast %30 : vector<16x16x4xf32> to vector<256x4xf32>
    %c4 = arith.constant 4 : index
    %c0_32 = arith.constant 0 : index
    %c0_33 = arith.constant 0 : index
    %32 = vector.load %arg2[%c4, %c0_32, %c0_33] : memref<9x4x8xf32, #tpu.memory_space<vmem>>, vector<1x4x8xf32>
    %33 = vector.shape_cast %32 : vector<1x4x8xf32> to vector<4x8xf32>
    %cst_34 = arith.constant dense<0.000000e+00> : vector<256x8xf32>
    %34 = tpu.matmul %31, %33, %cst_34 {dimension_numbers = #tpu.dot_dimension_numbers<[1], [0], [0], [1], [0, 0, 1, 1], [], []>} : vector<256x4xf32>, vector<4x8xf32>, vector<256x8xf32> -> vector<256x8xf32>
    %35 = arith.addf %28, %34 : vector<256x8xf32>
    %c0_35 = arith.constant 0 : index
    %c1_36 = arith.constant 1 : index
    %c2_37 = arith.constant 2 : index
    %c0_38 = arith.constant 0 : index
    %36 = vector.load %arg1[%c0_35, %c1_36, %c2_37, %c0_38] : memref<1x18x18x4xf32, #tpu.memory_space<vmem>>, vector<1x16x16x4xf32>
    %37 = vector.shape_cast %36 : vector<1x16x16x4xf32> to vector<16x16x4xf32>
    %38 = vector.shape_cast %37 : vector<16x16x4xf32> to vector<256x4xf32>
    %c5 = arith.constant 5 : index
    %c0_39 = arith.constant 0 : index
    %c0_40 = arith.constant 0 : index
    %39 = vector.load %arg2[%c5, %c0_39, %c0_40] : memref<9x4x8xf32, #tpu.memory_space<vmem>>, vector<1x4x8xf32>
    %40 = vector.shape_cast %39 : vector<1x4x8xf32> to vector<4x8xf32>
    %cst_41 = arith.constant dense<0.000000e+00> : vector<256x8xf32>
    %41 = tpu.matmul %38, %40, %cst_41 {dimension_numbers = #tpu.dot_dimension_numbers<[1], [0], [0], [1], [0, 0, 1, 1], [], []>} : vector<256x4xf32>, vector<4x8xf32>, vector<256x8xf32> -> vector<256x8xf32>
    %42 = arith.addf %35, %41 : vector<256x8xf32>
    %c0_42 = arith.constant 0 : index
    %c2_43 = arith.constant 2 : index
    %c0_44 = arith.constant 0 : index
    %c0_45 = arith.constant 0 : index
    %43 = vector.load %arg1[%c0_42, %c2_43, %c0_44, %c0_45] : memref<1x18x18x4xf32, #tpu.memory_space<vmem>>, vector<1x16x16x4xf32>
    %44 = vector.shape_cast %43 : vector<1x16x16x4xf32> to vector<16x16x4xf32>
    %45 = vector.shape_cast %44 : vector<16x16x4xf32> to vector<256x4xf32>
    %c6 = arith.constant 6 : index
    %c0_46 = arith.constant 0 : index
    %c0_47 = arith.constant 0 : index
    %46 = vector.load %arg2[%c6, %c0_46, %c0_47] : memref<9x4x8xf32, #tpu.memory_space<vmem>>, vector<1x4x8xf32>
    %47 = vector.shape_cast %46 : vector<1x4x8xf32> to vector<4x8xf32>
    %cst_48 = arith.constant dense<0.000000e+00> : vector<256x8xf32>
    %48 = tpu.matmul %45, %47, %cst_48 {dimension_numbers = #tpu.dot_dimension_numbers<[1], [0], [0], [1], [0, 0, 1, 1], [], []>} : vector<256x4xf32>, vector<4x8xf32>, vector<256x8xf32> -> vector<256x8xf32>
    %49 = arith.addf %42, %48 : vector<256x8xf32>
    %c0_49 = arith.constant 0 : index
    %c2_50 = arith.constant 2 : index
    %c1_51 = arith.constant 1 : index
    %c0_52 = arith.constant 0 : index
    %50 = vector.load %arg1[%c0_49, %c2_50, %c1_51, %c0_52] : memref<1x18x18x4xf32, #tpu.memory_space<vmem>>, vector<1x16x16x4xf32>
    %51 = vector.shape_cast %50 : vector<1x16x16x4xf32> to vector<16x16x4xf32>
    %52 = vector.shape_cast %51 : vector<16x16x4xf32> to vector<256x4xf32>
    %c7 = arith.constant 7 : index
    %c0_53 = arith.constant 0 : index
    %c0_54 = arith.constant 0 : index
    %53 = vector.load %arg2[%c7, %c0_53, %c0_54] : memref<9x4x8xf32, #tpu.memory_space<vmem>>, vector<1x4x8xf32>
    %54 = vector.shape_cast %53 : vector<1x4x8xf32> to vector<4x8xf32>
    %cst_55 = arith.constant dense<0.000000e+00> : vector<256x8xf32>
    %55 = tpu.matmul %52, %54, %cst_55 {dimension_numbers = #tpu.dot_dimension_numbers<[1], [0], [0], [1], [0, 0, 1, 1], [], []>} : vector<256x4xf32>, vector<4x8xf32>, vector<256x8xf32> -> vector<256x8xf32>
    %56 = arith.addf %49, %55 : vector<256x8xf32>
    %c0_56 = arith.constant 0 : index
    %c2_57 = arith.constant 2 : index
    %c2_58 = arith.constant 2 : index
    %c0_59 = arith.constant 0 : index
    %57 = vector.load %arg1[%c0_56, %c2_57, %c2_58, %c0_59] : memref<1x18x18x4xf32, #tpu.memory_space<vmem>>, vector<1x16x16x4xf32>
    %58 = vector.shape_cast %57 : vector<1x16x16x4xf32> to vector<16x16x4xf32>
    %59 = vector.shape_cast %58 : vector<16x16x4xf32> to vector<256x4xf32>
    %c8 = arith.constant 8 : index
    %c0_60 = arith.constant 0 : index
    %c0_61 = arith.constant 0 : index
    %60 = vector.load %arg2[%c8, %c0_60, %c0_61] : memref<9x4x8xf32, #tpu.memory_space<vmem>>, vector<1x4x8xf32>
    %61 = vector.shape_cast %60 : vector<1x4x8xf32> to vector<4x8xf32>
    %cst_62 = arith.constant dense<0.000000e+00> : vector<256x8xf32>
    %62 = tpu.matmul %59, %61, %cst_62 {dimension_numbers = #tpu.dot_dimension_numbers<[1], [0], [0], [1], [0, 0, 1, 1], [], []>} : vector<256x4xf32>, vector<4x8xf32>, vector<256x8xf32> -> vector<256x8xf32>
    %63 = arith.addf %56, %62 : vector<256x8xf32>
    %c0_63 = arith.constant 0 : index
    %c0_64 = arith.constant 0 : index
    %64 = vector.load %arg3[%c0_63, %c0_64] : memref<1x8xf32, #tpu.memory_space<vmem>>, vector<1x8xf32>
    %65 = vector.broadcast %64 : vector<1x8xf32> to vector<256x8xf32>
    %66 = arith.addf %63, %65 : vector<256x8xf32>
    %c0_65 = arith.constant 0 : index
    %c0_66 = arith.constant 0 : index
    %c0_67 = arith.constant 0 : index
    %67 = vector.load %arg4[%c0_65, %c0_66, %c0_67] : memref<1x256x8xf32, #tpu.memory_space<vmem>>, vector<1x256x8xf32>
    %68 = vector.shape_cast %67 : vector<1x256x8xf32> to vector<256x8xf32>
    %69 = vector.shape_cast %66 : vector<256x8xf32> to vector<1x256x8xf32>
    tpu.vector_store %arg4[%c0_65, %c0_66, %c0_67], %69 {strides = array<i32>} : memref<1x256x8xf32, #tpu.memory_space<vmem>>, vector<1x256x8xf32>,
    return
  }
  func.func @transform_0(%arg0: i32) -> (i32, i32, i32, i32) {
    %c0_i32 = arith.constant 0 : i32
    %c0_i32_0 = arith.constant 0 : i32
    %c0_i32_1 = arith.constant 0 : i32
    %c0_i32_2 = arith.constant 0 : i32
    return %arg0, %c0_i32, %c0_i32_0, %c0_i32_1 : i32, i32, i32, i32
  }
  func.func @transform_1(%arg0: i32) -> (i32, i32, i32) {
    %c0_i32 = arith.constant 0 : i32
    %c0_i32_0 = arith.constant 0 : i32
    %c0_i32_1 = arith.constant 0 : i32
    %c0_i32_2 = arith.constant 0 : i32
    return %c0_i32, %c0_i32_0, %c0_i32_1 : i32, i32, i32
  }
  func.func @transform_2(%arg0: i32) -> (i32, i32) {
    %c0_i32 = arith.constant 0 : i32
    %c0_i32_0 = arith.constant 0 : i32
    %c0_i32_1 = arith.constant 0 : i32
    return %c0_i32, %c0_i32_0 : i32, i32
  }
  func.func @transform_3(%arg0: i32) -> (i32, i32, i32) {
    %c0_i32 = arith.constant 0 : i32
    %c0_i32_0 = arith.constant 0 : i32
    %c0_i32_1 = arith.constant 0 : i32
    return %arg0, %c0_i32, %c0_i32_0 : i32, i32, i32
  }
}

</mosaic_0001>

<bundles_post_ra>
// kernel: masked_conv2d.1
= control target key start
LH: loop header
LB: loop body
LE: loop exit
PB: predicated region body
PF: predicated region fallthrough
CT: control target
= control target key end

     0   :  { %s5042_s12 = smov 0   ;;  %s6577_s0 = inlined_call_operand.vmem [shape: f32[2,18,18,4], index: 0, kind: input, shape index: {}]   ;;  %s6578_s1 = inlined_call_operand.vmem [shape: f32[9,4,8], index: 1, kind: input, shape index: {}]   ;;  %s6579_s2 = inlined_call_operand.vmem [shape: f32[1,8], index: 2, kind: input, shape index: {}]   ;;  %s6580_s3 = inlined_call_operand.vmem [shape: f32[2,256,8], index: 3, kind: output, shape index: {}]  }
   0x1 LB: > { %s3747_s13 = sadd.s32 4294967295, %s5020_s12   ;;  %p3751_p0 = scmp.ge.s32.totalorder %s5020_s12, 1  ;;  %s5020_s12 = sphi %s5042_s12, %s13_s12  }
   0x2   : > { %p137_p1 = scmp.lt.s32.totalorder %s5020_s12, 3 }
   0x4   : > { %p138_p2 = pnand %p3751_p0, %p137_p1 }
   0x6   : > { %141 = sbr.rel (%p138_p2) target bundleno = 506 (0x1fa), region = 32 }
   0xb   : > { %v3755_v0 = vld [vmem:[%s6578_s1 + $0x4] sm:$0xf]  ;;  %vm335_vm0 = vcmask 1043456   ;;  %p161_p3 = scmp.lt.s32.totalorder %s3747_s13, 1  ;;  %v203_v1 = vld [vmem:[%s6578_s1] sm:$0xf] }
   0xc   : > { %5003 = vmatprep.subr.msk.mxu1 %vm335_vm0, %v3755_v0  ;;  %4553 = vmatprep.subr.msk.mxu0 %vm335_vm0, %v3755_v0  ;;  %v3822_v2 = vld [vmem:[%s6578_s1 + $0x8] sm:$0xf]  ;;  %vm238_vm1 = vcmask 31744   ;;  %v5096_v9 = vld [vmem:[%s6578_s1 + $0xc] sm:$0xf]  ;;  %vm3659_vm2 = vcmask 64512  }
   0xd   : > { %5004 = vmatpush3.msk.msra.mxu1 %vm335_vm0, %v3755_v0  ;;  %4554 = vmatpush3.msk.msra.mxu0 %vm335_vm0, %v3755_v0  ;;  %s6808_s13 = smov (!%p161_p3, %s3747_s13), 1  ;;  %v5101_v10 = vld [vmem:[%s6578_s1 + $0x10] sm:$0xf]  ;;  %v5260_v43 = vld [vmem:[%s6578_s1 + $0x14] sm:$0xf] }
   0xe   : > { %4603 = vmatprep.subr.msk.mxu1 %vm335_vm0, %v203_v1  ;;  %4653 = vmatprep.subr.msk.mxu0 %vm335_vm0, %v3822_v2  ;;  %s5005_s20 = smul.u32 432, %s6808_s13  ;;  %v5265_v44 = vld [vmem:[%s6578_s1 + $0x18] sm:$0xf]  ;;  %s4255_s9 = sshll.u32 %s6808_s13, 8 }
   0xf   : > { %s6395_s13 = scalar_lea.vmem %s6580_s3, %s4255_s9 }
  0x10   : > { %s5071_s23 = scalar_lea.vmem %s6577_s0, %s5005_s20 }
  0x11   : > { %v204_v3 = vld [vmem:[%s5071_s23 + $0x1] sm:$0xff]  ;;  %v205_v5 = vld [vmem:[%s5071_s23 + $0x9] sm:$0xff]  ;;  %v5085_v7 = vld [vmem:[%s5071_s23 + $0x19] sm:$0xff] }
  0x12   : > { %v5075_v4 = vld [vmem:[%s5071_s23 + $0xc1] sm:$0xff]  ;;  %4555 = vmatprep.mubr.msk.f32.mxu0 %vm238_vm1, %v204_v3  ;;  %v5082_v6 = vld [vmem:[%s5071_s23 + $0xc9] sm:$0xff]  ;;  %v5088_v8 = vld [vmem:[%s5071_s23 + $0xd9] sm:$0xff] }
  0x13   : > { %4579 = vmatprep.mubr.msk.f32.mxu1 %vm238_vm1, %v5075_v4  ;;  %4556 = vmatmul.mubr.msk.f32.vlgmr.msra.gmra.mxu0 %vm238_vm1, %v205_v5  ;;  %v5106_v11 = vld [vmem:[%s5071_s23 + $0x21] sm:$0xff]  ;;  %v5116_v13 = vld [vmem:[%s5071_s23 + $0x31] sm:$0xff]  ;;  %v5134_v15 = vld [vmem:[%s5071_s23 + $0x39] sm:$0xff] }
  0x14   : > { %4580 = vmatmul.mubr.msk.f32.vlgmr.msra.gmra.mxu1 %vm238_vm1, %v5082_v6  ;;  %4654 = vmatpush3.msk.msra.mxu0 %vm335_vm0, %v3822_v2  ;;  %v5109_v12 = vld [vmem:[%s5071_s23 + $0xe1] sm:$0xff]  ;;  %v5119_v14 = vld [vmem:[%s5071_s23 + $0xf1] sm:$0xff]  ;;  %v5137_v16 = vld [vmem:[%s5071_s23 + $0xf9] sm:$0xff] }
  0x15   : > { %4604 = vmatpush3.msk.msra.mxu1 %vm335_vm0, %v203_v1  ;;  %4558 = vmatprep.mubr.msk.f32.mxu0 %vm238_vm1, %v5085_v7  ;;  %v5140_v17 = vld [vmem:[%s5071_s23 + $0x49] sm:$0xff]  ;;  %v5154_v19 = vld [vmem:[%s5071_s23 + $0x51] sm:$0xff]  ;;  %v5160_v21 = vld [vmem:[%s5071_s23 + $0x61] sm:$0xff] }
  0x16   : > { %4582 = vmatprep.mubr.msk.f32.mxu1 %vm238_vm1, %v5088_v8  ;;  %4703 = vmatprep.subr.msk.mxu1 %vm335_vm0, %v5096_v9  ;;  %v5143_v18 = vld [vmem:[%s5071_s23 + $0x109] sm:$0xff]  ;;  %v5157_v20 = vld [vmem:[%s5071_s23 + $0x111] sm:$0xff]  ;;  %v5163_v22 = vld [vmem:[%s5071_s23 + $0x121] sm:$0xff] }
  0x17   : > { %4753 = vmatprep.subr.msk.mxu0 %vm335_vm0, %v5101_v10  ;;  %4559 = vmatmul.mubr.msk.f32.gmra.mxu0 %vm238_vm1, %v5106_v11  ;;  %v5174_v23 = vld [vmem:[%s5071_s23 + $0x69] sm:$0xff]  ;;  %v5180_v25 = vld [vmem:[%s5071_s23 + $0x79] sm:$0xff]  ;;  %v5194_v27 = vld [vmem:[%s5071_s23 + $0x81] sm:$0xff] }
  0x18   : > { %4583 = vmatmul.mubr.msk.f32.gmra.mxu1 %vm238_vm1, %v5109_v12  ;;  %4561 = vmatprep.mubr.msk.f32.mxu0 %vm238_vm1, %v5116_v13  ;;  %v5177_v24 = vld [vmem:[%s5071_s23 + $0x129] sm:$0xff]  ;;  %v5183_v26 = vld [vmem:[%s5071_s23 + $0x139] sm:$0xff]  ;;  %v5197_v28 = vld [vmem:[%s5071_s23 + $0x141] sm:$0xff] }
  0x19   : > { %4585 = vmatprep.mubr.msk.f32.mxu1 %vm238_vm1, %v5119_v14  ;;  %v5200_v29 = vld [vmem:[%s5071_s23 + $0x91] sm:$0xff]  ;;  %v5214_v31 = vld [vmem:[%s5071_s23 + $0x99] sm:$0xff]  ;;  %v5220_v33 = vld [vmem:[%s5071_s23 + $0xa9] sm:$0xff] }
  0x1a   : > { %v5203_v30 = vld [vmem:[%s5071_s23 + $0x151] sm:$0xff]  ;;  %v5217_v32 = vld [vmem:[%s5071_s23 + $0x159] sm:$0xff]  ;;  %v5223_v34 = vld [vmem:[%s5071_s23 + $0x169] sm:$0xff] }
  0x1b   : > { %4562 = vmatmul.mubr.msk.f32.gmra.mxu0 %vm238_vm1, %v5134_v15  ;;  %v5234_v35 = vld [vmem:[%s5071_s23 + $0xb1] sm:$0xff]  ;;  %v171_v37 = vld [vmem:[%s5071_s23] sm:$0xff]  ;;  %v172_v39 = vld [vmem:[%s5071_s23 + $0x8] sm:$0xff] }
  0x1c   : > { %4586 = vmatmul.mubr.msk.f32.gmra.mxu1 %vm238_vm1, %v5137_v16  ;;  %4564 = vmatprep.mubr.msk.f32.mxu0 %vm238_vm1, %v5140_v17  ;;  %v5237_v36 = vld [vmem:[%s5071_s23 + $0x171] sm:$0xff]  ;;  %v888_v38 = vld [vmem:[%s5071_s23 + $0x2] sm:$0xff]  ;;  %v5253_v42 = vld [vmem:[%s5071_s23 + $0x1a] sm:$0xff] }
  0x1d   : > { %4588 = vmatprep.mubr.msk.f32.mxu1 %vm238_vm1, %v5143_v18  ;;  %6641 = vst [vmem:[#allocation2_spill] sm:$0xff] %v5237_v36  ;;  %v889_v40 = vld [vmem:[%s5071_s23 + $0xa] sm:$0xff]  ;;  %v5250_v41 = vld [vmem:[%s5071_s23 + $0x18] sm:$0xff]  ;;  %6642 = vst [vmem:[#allocation3_spill] sm:$0xff] %v5253_v42 }
  0x1e   : > { %v5272_v45 = vld [vmem:[%s5071_s23 + $0x20] sm:$0xff]  ;;  %v5282_v47 = vld [vmem:[%s5071_s23 + $0x30] sm:$0xff]  ;;  %v5300_v49 = vld [vmem:[%s5071_s23 + $0x38] sm:$0xff] }
  0x1f   : > { %4565 = vmatmul.mubr.msk.f32.gmra.mxu0 %vm238_vm1, %v5154_v19  ;;  %v5275_v46 = vld [vmem:[%s5071_s23 + $0x22] sm:$0xff]  ;;  %v5285_v48 = vld [vmem:[%s5071_s23 + $0x32] sm:$0xff]  ;;  %v5303_v50 = vld [vmem:[%s5071_s23 + $0x3a] sm:$0xff] }
  0x20   : > { %4589 = vmatmul.mubr.msk.f32.gmra.mxu1 %vm238_vm1, %v5157_v20  ;;  %4567 = vmatprep.mubr.msk.f32.mxu0 %vm238_vm1, %v5160_v21  ;;  %6643 = vst [vmem:[#allocation4_spill] sm:$0xff] %v5275_v46  ;;  %6644 = vst [vmem:[#allocation5_spill] sm:$0xff] %v5285_v48  ;;  %v5306_v51 = vld [vmem:[%s5071_s23 + $0x48] sm:$0xff]  ;;  %v5320_v53 = vld [vmem:[%s5071_s23 + $0x50] sm:$0xff] }
  0x21   : > { %4591 = vmatprep.mubr.msk.f32.mxu1 %vm238_vm1, %v5163_v22  ;;  %6645 = vst [vmem:[#allocation6_spill] sm:$0xff] %v5303_v50  ;;  %v5309_v52 = vld [vmem:[%s5071_s23 + $0x4a] sm:$0xff]  ;;  %v5323_v54 = vld [vmem:[%s5071_s23 + $0x52] sm:$0xff]  ;;  %v5326_v55 = vld [vmem:[%s5071_s23 + $0x60] sm:$0xff] }
  0x22   : > { %6646 = vst [vmem:[#allocation7_spill] sm:$0xff] %v5309_v52  ;;  %6647 = vst [vmem:[#allocation8_spill] sm:$0xff] %v5323_v54  ;;  %v5329_v56 = vld [vmem:[%s5071_s23 + $0x62] sm:$0xff]  ;;  %v5343_v58 = vld [vmem:[%s5071_s23 + $0x6a] sm:$0xff] }
  0x23   : > { %4568 = vmatmul.mubr.msk.f32.gmra.mxu0 %vm238_vm1, %v5174_v23  ;;  %6648 = vst [vmem:[#allocation9_spill] sm:$0xff] %v5329_v56  ;;  %v5340_v57 = vld [vmem:[%s5071_s23 + $0x68] sm:$0xff]  ;;  %6649 = vst [vmem:[#allocation10_spill] sm:$0xff] %v5343_v58  ;;  %v5346_v59 = vld [vmem:[%s5071_s23 + $0x78] sm:$0xff] }
  0x24   : > { %4592 = vmatmul.mubr.msk.f32.gmra.mxu1 %vm238_vm1, %v5177_v24  ;;  %4570 = vmatprep.mubr.msk.f32.mxu0 %vm238_vm1, %v5180_v25  ;;  %v5349_v60 = vld [vmem:[%s5071_s23 + $0x7a] sm:$0xff]  ;;  %v5363_v62 = vld [vmem:[%s5071_s23 + $0x82] sm:$0xff]  ;;  %v5366_v63 = vld [vmem:[%s5071_s23 + $0x90] sm:$0xff] }
  0x25   : > { %4594 = vmatprep.mubr.msk.f32.mxu1 %vm238_vm1, %v5183_v26  ;;  %6650 = vst [vmem:[#allocation11_spill] sm:$0xff] %v5349_v60  ;;  %v5360_v61 = vld [vmem:[%s5071_s23 + $0x80] sm:$0xff]  ;;  %6651 = vst [vmem:[#allocation12_spill] sm:$0xff] %v5363_v62  ;;  %v5369_v0 = vld [vmem:[%s5071_s23 + $0x92] sm:$0xff] }
  0x26   : > { %6652 = vst [vmem:[#allocation13_spill] sm:$0xff] %v5369_v0  ;;  %v5380_v1 = vld [vmem:[%s5071_s23 + $0x98] sm:$0xff]  ;;  %v5386_v3 = vld [vmem:[%s5071_s23 + $0xa8] sm:$0xff] }
  0x27   : > { %4571 = vmatmul.mubr.msk.f32.gmra.mxu0 %vm238_vm1, %v5194_v27  ;;  %v5383_v2 = vld [vmem:[%s5071_s23 + $0x9a] sm:$0xff]  ;;  %v5389_v5 = vld [vmem:[%s5071_s23 + $0xaa] sm:$0xff] }
  0x28   : > { %4595 = vmatmul.mubr.msk.f32.gmra.mxu1 %vm238_vm1, %v5197_v28  ;;  %4573 = vmatprep.mubr.msk.f32.mxu0 %vm238_vm1, %v5200_v29  ;;  %6653 = vst [vmem:[#allocation14_spill] sm:$0xff] %v5383_v2  ;;  %6654 = vst [vmem:[#allocation15_spill] sm:$0xff] %v5389_v5 }
  0x29   : > { %4597 = vmatprep.mubr.msk.f32.mxu1 %vm238_vm1, %v5203_v30 }
  0x2b   : > { %4574 = vmatmul.mubr.msk.f32.gmra.mxu0 %vm238_vm1, %v5214_v31 }
  0x2c   : > { %4598 = vmatmul.mubr.msk.f32.gmra.mxu1 %vm238_vm1, %v5217_v32  ;;  %4576 = vmatprep.mubr.msk.f32.mxu0 %vm238_vm1, %v5220_v33 }
  0x2d   : > { %4600 = vmatprep.mubr.msk.f32.mxu1 %vm238_vm1, %v5223_v34 }
  0x2f   : > { %4577 = vmatmul.mubr.msk.f32.gmra.mxu0 %vm238_vm1, %v5234_v35 }
  0x30   : > { %4601 = vmatmul.mubr.msk.f32.gmra.mxu1 %vm238_vm1, %v5237_v36  ;;  %4655 = vmatprep.mubr.msk.f32.mxu0 %vm238_vm1, %v888_v38  ;;  %v5409_v38 = vld [vmem:[%s5071_s23 + $0xc2] sm:$0xff]  ;;  %v5549_v36 = vld [vmem:[%s5071_s23 + $0x16a] sm:$0xff] }
  0x31   : > { %4605 = vmatprep.mubr.msk.f32.mxu1 %vm238_vm1, %v171_v37  ;;  %v5406_v37 = vld [vmem:[%s5071_s23 + $0xc0] sm:$0xff]  ;;  %6656 = vst [vmem:[#allocation17_spill] sm:$0xff] %v5409_v38  ;;  %6670 = vst [vmem:[#allocation31_spill] sm:$0xff] %v5549_v36 }
  0x33   : > { %4656 = vmatmul.mubr.msk.f32.vlgmr.msra.gmra.mxu0 %vm238_vm1, %v889_v40  ;;  %v5423_v40 = vld [vmem:[%s5071_s23 + $0xca] sm:$0xff] }
  0x34   : > { %4606 = vmatmul.mubr.msk.f32.vlgmr.msra.gmra.mxu1 %vm238_vm1, %v172_v39  ;;  %4754 = vmatpush3.msk.msra.mxu0 %vm335_vm0, %v5101_v10  ;;  %v5403_v10 = vld [vmem:[%s5071_s23 + $0xb2] sm:$0xff]  ;;  %v5420_v39 = vld [vmem:[%s5071_s23 + $0xc8] sm:$0xff]  ;;  %6657 = vst [vmem:[#allocation18_spill] sm:$0xff] %v5423_v40 }
  0x35   : > { %4704 = vmatpush3.msk.msra.mxu1 %vm335_vm0, %v5096_v9  ;;  %4608 = vmatprep.mubr.msk.f32.mxu1 %vm238_vm1, %v5250_v41  ;;  %v5400_v9 = vld [vmem:[%s5071_s23 + $0xb0] sm:$0xff]  ;;  %6655 = vst [vmem:[#allocation16_spill] sm:$0xff] %v5403_v10 }
  0x36   : > { %4658 = vmatprep.mubr.msk.f32.mxu0 %vm238_vm1, %v5253_v42  ;;  %4803 = vmatprep.subr.msk.mxu1 %vm335_vm0, %v5260_v43  ;;  %v5546_v42 = vld [vmem:[%s5071_s23 + $0x168] sm:$0xff] }
  0x37   : > { %4853 = vmatprep.subr.msk.mxu0 %vm335_vm0, %v5265_v44  ;;  %4659 = vmatmul.mubr.msk.f32.gmra.mxu0 %vm238_vm1, %v5275_v46  ;;  %v5529_v46 = vld [vmem:[%s5071_s23 + $0x152] sm:$0xff] }
  0x38   : > { %4609 = vmatmul.mubr.msk.f32.gmra.mxu1 %vm238_vm1, %v5272_v45  ;;  %4661 = vmatprep.mubr.msk.f32.mxu0 %vm238_vm1, %v5285_v48  ;;  %v5526_v48 = vld [vmem:[%s5071_s23 + $0x150] sm:$0xff]  ;;  %6668 = vst [vmem:[#allocation29_spill] sm:$0xff] %v5529_v46 }
  0x39   : > { %4611 = vmatprep.mubr.msk.f32.mxu1 %vm238_vm1, %v5282_v47 }
  0x3b   : > { %4662 = vmatmul.mubr.msk.f32.gmra.mxu0 %vm238_vm1, %v5303_v50  ;;  %v5509_v50 = vld [vmem:[%s5071_s23 + $0x13a] sm:$0xff] }
  0x3c   : > { %4612 = vmatmul.mubr.msk.f32.gmra.mxu1 %vm238_vm1, %v5300_v49  ;;  %4664 = vmatprep.mubr.msk.f32.mxu0 %vm238_vm1, %v5309_v52  ;;  %v5506_v52 = vld [vmem:[%s5071_s23 + $0x138] sm:$0xff]  ;;  %6666 = vst [vmem:[#allocation27_spill] sm:$0xff] %v5509_v50 }
  0x3d   : > { %4614 = vmatprep.mubr.msk.f32.mxu1 %vm238_vm1, %v5306_v51 }
  0x3f   : > { %4665 = vmatmul.mubr.msk.f32.gmra.mxu0 %vm238_vm1, %v5323_v54  ;;  %v5489_v54 = vld [vmem:[%s5071_s23 + $0x122] sm:$0xff] }
  0x40   : > { %4615 = vmatmul.mubr.msk.f32.gmra.mxu1 %vm238_vm1, %v5320_v53  ;;  %4667 = vmatprep.mubr.msk.f32.mxu0 %vm238_vm1, %v5329_v56  ;;  %v5486_v56 = vld [vmem:[%s5071_s23 + $0x120] sm:$0xff]  ;;  %6664 = vst [vmem:[#allocation25_spill] sm:$0xff] %v5489_v54 }
  0x41   : > { %4617 = vmatprep.mubr.msk.f32.mxu1 %vm238_vm1, %v5326_v55 }
  0x43   : > { %4668 = vmatmul.mubr.msk.f32.gmra.mxu0 %vm238_vm1, %v5343_v58  ;;  %v5469_v58 = vld [vmem:[%s5071_s23 + $0x10a] sm:$0xff] }
  0x44   : > { %4618 = vmatmul.mubr.msk.f32.gmra.mxu1 %vm238_vm1, %v5340_v57  ;;  %4670 = vmatprep.mubr.msk.f32.mxu0 %vm238_vm1, %v5349_v60  ;;  %v5466_v60 = vld [vmem:[%s5071_s23 + $0x108] sm:$0xff]  ;;  %6662 = vst [vmem:[#allocation23_spill] sm:$0xff] %v5469_v58 }
  0x45   : > { %4620 = vmatprep.mubr.msk.f32.mxu1 %vm238_vm1, %v5346_v59 }
  0x47   : > { %4671 = vmatmul.mubr.msk.f32.gmra.mxu0 %vm238_vm1, %v5363_v62  ;;  %v5449_v62 = vld [vmem:[%s5071_s23 + $0xf2] sm:$0xff] }
  0x48   : > { %4621 = vmatmul.mubr.msk.f32.gmra.mxu1 %vm238_vm1, %v5360_v61  ;;  %4673 = vmatprep.mubr.msk.f32.mxu0 %vm238_vm1, %v5369_v0  ;;  %v5446_v0 = vld [vmem:[%s5071_s23 + $0xf0] sm:$0xff]  ;;  %6660 = vst [vmem:[#allocation21_spill] sm:$0xff] %v5449_v62 }
  0x49   : > { %4623 = vmatprep.mubr.msk.f32.mxu1 %vm238_vm1, %v5366_v63 }
  0x4b   : > { %4674 = vmatmul.mubr.msk.f32.gmra.mxu0 %vm238_vm1, %v5383_v2  ;;  %v5429_v2 = vld [vmem:[%s5071_s23 + $0xda] sm:$0xff] }
  0x4c   : > { %4624 = vmatmul.mubr.msk.f32.gmra.mxu1 %vm238_vm1, %v5380_v1  ;;  %4676 = vmatprep.mubr.msk.f32.mxu0 %vm238_vm1, %v5389_v5  ;;  %v5426_v5 = vld [vmem:[%s5071_s23 + $0xd8] sm:$0xff]  ;;  %6658 = vst [vmem:[#allocation19_spill] sm:$0xff] %v5429_v2 }
  0x4d   : > { %4626 = vmatprep.mubr.msk.f32.mxu1 %vm238_vm1, %v5386_v3 }
  0x4f   : > { %4677 = vmatmul.mubr.msk.f32.gmra.mxu0 %vm238_vm1, %v5403_v10  ;;  %v5443_v10 = vld [vmem:[%s5071_s23 + $0xe2] sm:$0xff] }
  0x50   : > { %4627 = vmatmul.mubr.msk.f32.gmra.mxu1 %vm238_vm1, %v5400_v9  ;;  %4679 = vmatprep.mubr.msk.f32.mxu0 %vm238_vm1, %v5409_v38  ;;  %v5440_v38 = vld [vmem:[%s5071_s23 + $0xe0] sm:$0xff]  ;;  %6659 = vst [vmem:[#allocation20_spill] sm:$0xff] %v5443_v10 }
  0x51   : > { %4629 = vmatprep.mubr.msk.f32.mxu1 %vm238_vm1, %v5406_v37 }
  0x53   : > { %4680 = vmatmul.mubr.msk.f32.gmra.mxu0 %vm238_vm1, %v5423_v40  ;;  %v5463_v40 = vld [vmem:[%s5071_s23 + $0xfa] sm:$0xff] }
  0x54   : > { %4630 = vmatmul.mubr.msk.f32.gmra.mxu1 %vm238_vm1, %v5420_v39  ;;  %4682 = vmatprep.mubr.msk.f32.mxu0 %vm238_vm1, %v5429_v2  ;;  %v5460_v2 = vld [vmem:[%s5071_s23 + $0xf8] sm:$0xff]  ;;  %6661 = vst [vmem:[#allocation22_spill] sm:$0xff] %v5463_v40 }
  0x55   : > { %4632 = vmatprep.mubr.msk.f32.mxu1 %vm238_vm1, %v5426_v5 }
  0x57   : > { %4683 = vmatmul.mubr.msk.f32.gmra.mxu0 %vm238_vm1, %v5443_v10  ;;  %v5483_v10 = vld [vmem:[%s5071_s23 + $0x112] sm:$0xff] }
  0x58   : > { %4633 = vmatmul.mubr.msk.f32.gmra.mxu1 %vm238_vm1, %v5440_v38  ;;  %4685 = vmatprep.mubr.msk.f32.mxu0 %vm238_vm1, %v5449_v62  ;;  %v5480_v62 = vld [vmem:[%s5071_s23 + $0x110] sm:$0xff]  ;;  %6663 = vst [vmem:[#allocation24_spill] sm:$0xff] %v5483_v10 }
  0x59   : > { %4635 = vmatprep.mubr.msk.f32.mxu1 %vm238_vm1, %v5446_v0 }
  0x5b   : > { %4686 = vmatmul.mubr.msk.f32.gmra.mxu0 %vm238_vm1, %v5463_v40  ;;  %v5503_v40 = vld [vmem:[%s5071_s23 + $0x12a] sm:$0xff] }
  0x5c   : > { %4636 = vmatmul.mubr.msk.f32.gmra.mxu1 %vm238_vm1, %v5460_v2  ;;  %4688 = vmatprep.mubr.msk.f32.mxu0 %vm238_vm1, %v5469_v58  ;;  %v5500_v58 = vld [vmem:[%s5071_s23 + $0x128] sm:$0xff]  ;;  %6665 = vst [vmem:[#allocation26_spill] sm:$0xff] %v5503_v40 }
  0x5d   : > { %4638 = vmatprep.mubr.msk.f32.mxu1 %vm238_vm1, %v5466_v60 }
  0x5f   : > { %4689 = vmatmul.mubr.msk.f32.gmra.mxu0 %vm238_vm1, %v5483_v10  ;;  %v5523_v10 = vld [vmem:[%s5071_s23 + $0x142] sm:$0xff] }
  0x60   : > { %4639 = vmatmul.mubr.msk.f32.gmra.mxu1 %vm238_vm1, %v5480_v62  ;;  %4691 = vmatprep.mubr.msk.f32.mxu0 %vm238_vm1, %v5489_v54  ;;  %v5520_v54 = vld [vmem:[%s5071_s23 + $0x140] sm:$0xff]  ;;  %6667 = vst [vmem:[#allocation28_spill] sm:$0xff] %v5523_v10 }
  0x61   : > { %4641 = vmatprep.mubr.msk.f32.mxu1 %vm238_vm1, %v5486_v56 }
  0x63   : > { %4692 = vmatmul.mubr.msk.f32.gmra.mxu0 %vm238_vm1, %v5503_v40  ;;  %v5543_v40 = vld [vmem:[%s5071_s23 + $0x15a] sm:$0xff] }
  0x64   : > { %4642 = vmatmul.mubr.msk.f32.gmra.mxu1 %vm238_vm1, %v5500_v58  ;;  %4694 = vmatprep.mubr.msk.f32.mxu0 %vm238_vm1, %v5509_v50  ;;  %v5540_v50 = vld [vmem:[%s5071_s23 + $0x158] sm:$0xff]  ;;  %6669 = vst [vmem:[#allocation30_spill] sm:$0xff] %v5543_v40 }
  0x65   : > { %4644 = vmatprep.mubr.msk.f32.mxu1 %vm238_vm1, %v5506_v52 }
  0x67   : > { %4695 = vmatmul.mubr.msk.f32.gmra.mxu0 %vm238_vm1, %v5523_v10  ;;  %v5563_v10 = vld [vmem:[%s5071_s23 + $0x172] sm:$0xff] }
  0x68   : > { %4645 = vmatmul.mubr.msk.f32.gmra.mxu1 %vm238_vm1, %v5520_v54  ;;  %4697 = vmatprep.mubr.msk.f32.mxu0 %vm238_vm1, %v5529_v46  ;;  %v5560_v46 = vld [vmem:[%s5071_s23 + $0x170] sm:$0xff]  ;;  %6671 = vst [vmem:[#allocation32_spill] sm:$0xff] %v5563_v10 }
  0x69   : > { %4647 = vmatprep.mubr.msk.f32.mxu1 %vm238_vm1, %v5526_v48 }
  0x6b   : > { %4698 = vmatmul.mubr.msk.f32.gmra.mxu0 %vm238_vm1, %v5543_v40 }
  0x6c   : > { %4648 = vmatmul.mubr.msk.f32.gmra.mxu1 %vm238_vm1, %v5540_v50  ;;  %4700 = vmatprep.mubr.msk.f32.mxu0 %vm238_vm1, %v5549_v36  ;;  %v5580_v36 = vld [vmem:[%s6578_s1 + $0x1c] sm:$0xf] }
  0x6d   : > { %4650 = vmatprep.mubr.msk.f32.mxu1 %vm238_vm1, %v5546_v42 }
  0x6f   : > { %4701 = vmatmul.mubr.msk.f32.gmra.mxu0 %vm238_vm1, %v5563_v10  ;;  %v5585_v10 = vld [vmem:[%s6578_s1 + $0x20] sm:$0xf] }
  0x70   : > { %4651 = vmatmul.mubr.msk.f32.gmra.mxu1 %vm238_vm1, %v5560_v46  ;;  %4755 = vmatprep.mubr.msk.f32.mxu0 %vm238_vm1, %v5085_v7  ;;  %v6673_v7 = vld [vmem:[#allocation2_spill] sm:$0xff] }
  0x71   : > { %4705 = vmatprep.mubr.msk.f32.mxu1 %vm238_vm1, %v5250_v41 }
  0x73   : > { %4756 = vmatmul.mubr.msk.f32.vlgmr.msra.gmra.mxu0 %vm238_vm1, %v5106_v11  ;;  %v5721_v11 = vld [vmem:[%s5071_s23 + $0x189] sm:$0xff] }
  0x74   : > { %4706 = vmatmul.mubr.msk.f32.vlgmr.msra.gmra.mxu1 %vm238_vm1, %v5272_v45  ;;  %4854 = vmatpush3.msk.msra.mxu0 %vm335_vm0, %v5265_v44  ;;  %6674 = vst [vmem:[#allocation2_spill] sm:$0xff] %v5721_v11  ;;  %v6692_v44 = vld [vmem:[#allocation20_spill] sm:$0xff]  ;;  %v6693_v45 = vld [vmem:[#allocation21_spill] sm:$0xff] }
  0x75   : > { %4804 = vmatpush3.msk.msra.mxu1 %vm335_vm0, %v5260_v43  ;;  %4708 = vmatprep.mubr.msk.f32.mxu1 %vm238_vm1, %v5282_v47 }
  0x76   : > { %4758 = vmatprep.mubr.msk.f32.mxu0 %vm238_vm1, %v5116_v13  ;;  %4903 = vmatprep.subr.msk.mxu1 %vm335_vm0, %v5580_v36 }
  0x77   : > { %4953 = vmatprep.subr.msk.mxu0 %vm335_vm0, %v5585_v10  ;;  %4759 = vmatmul.mubr.msk.f32.gmra.mxu0 %vm238_vm1, %v5134_v15 }
  0x78   : > { %4709 = vmatmul.mubr.msk.f32.gmra.mxu1 %vm238_vm1, %v5300_v49  ;;  %4761 = vmatprep.mubr.msk.f32.mxu0 %vm238_vm1, %v5140_v17 }
  0x79   : > { %4711 = vmatprep.mubr.msk.f32.mxu1 %vm238_vm1, %v5306_v51 }
  0x7b   : > { %4762 = vmatmul.mubr.msk.f32.gmra.mxu0 %vm238_vm1, %v5154_v19 }
  0x7c   : > { %4712 = vmatmul.mubr.msk.f32.gmra.mxu1 %vm238_vm1, %v5320_v53  ;;  %4764 = vmatprep.mubr.msk.f32.mxu0 %vm238_vm1, %v5160_v21 }
  0x7d   : > { %4714 = vmatprep.mubr.msk.f32.mxu1 %vm238_vm1, %v5326_v55 }
  0x7f   : > { %4765 = vmatmul.mubr.msk.f32.gmra.mxu0 %vm238_vm1, %v5174_v23 }
  0x80   : > { %4715 = vmatmul.mubr.msk.f32.gmra.mxu1 %vm238_vm1, %v5340_v57  ;;  %4767 = vmatprep.mubr.msk.f32.mxu0 %vm238_vm1, %v5180_v25 }
  0x81   : > { %4717 = vmatprep.mubr.msk.f32.mxu1 %vm238_vm1, %v5346_v59 }
  0x83   : > { %4768 = vmatmul.mubr.msk.f32.gmra.mxu0 %vm238_vm1, %v5194_v27 }
  0x84   : > { %4718 = vmatmul.mubr.msk.f32.gmra.mxu1 %vm238_vm1, %v5360_v61  ;;  %4770 = vmatprep.mubr.msk.f32.mxu0 %vm238_vm1, %v5200_v29  ;;  %v6684_v29 = vld [vmem:[#allocation12_spill] sm:$0xff] }
  0x85   : > { %4720 = vmatprep.mubr.msk.f32.mxu1 %vm238_vm1, %v5366_v63 }
  0x87   : > { %4771 = vmatmul.mubr.msk.f32.gmra.mxu0 %vm238_vm1, %v5214_v31  ;;  %v6686_v31 = vld [vmem:[#allocation14_spill] sm:$0xff] }
  0x88   : > { %4721 = vmatmul.mubr.msk.f32.gmra.mxu1 %vm238_vm1, %v5380_v1  ;;  %4773 = vmatprep.mubr.msk.f32.mxu0 %vm238_vm1, %v5220_v33  ;;  %v6688_v33 = vld [vmem:[#allocation16_spill] sm:$0xff] }
  0x89   : > { %4723 = vmatprep.mubr.msk.f32.mxu1 %vm238_vm1, %v5386_v3 }
  0x8b   : > { %4774 = vmatmul.mubr.msk.f32.gmra.mxu0 %vm238_vm1, %v5234_v35  ;;  %v6690_v35 = vld [vmem:[#allocation18_spill] sm:$0xff] }
  0x8c   : > { %4724 = vmatmul.mubr.msk.f32.gmra.mxu1 %vm238_vm1, %v5400_v9  ;;  %4776 = vmatprep.mubr.msk.f32.mxu0 %vm238_vm1, %v5075_v4  ;;  %v5704_v4 = vld [vmem:[%s5071_s23 + $0x180] sm:$0xff] }
  0x8d   : > { %4726 = vmatprep.mubr.msk.f32.mxu1 %vm238_vm1, %v5406_v37 }
  0x8f   : > { %4777 = vmatmul.mubr.msk.f32.gmra.mxu0 %vm238_vm1, %v5082_v6  ;;  %v5707_v6 = vld [vmem:[%s5071_s23 + $0x181] sm:$0xff] }
  0x90   : > { %4727 = vmatmul.mubr.msk.f32.gmra.mxu1 %vm238_vm1, %v5420_v39  ;;  %4779 = vmatprep.mubr.msk.f32.mxu0 %vm238_vm1, %v5088_v8  ;;  %6672 = vst [vmem:[#allocation33_spill] sm:$0xff] %v5707_v6  ;;  %v5718_v8 = vld [vmem:[%s5071_s23 + $0x188] sm:$0xff] }
  0x91   : > { %4729 = vmatprep.mubr.msk.f32.mxu1 %vm238_vm1, %v5426_v5 }
  0x93   : > { %4780 = vmatmul.mubr.msk.f32.gmra.mxu0 %vm238_vm1, %v5109_v12  ;;  %v6675_v12 = vld [vmem:[#allocation3_spill] sm:$0xff] }
  0x94   : > { %4730 = vmatmul.mubr.msk.f32.gmra.mxu1 %vm238_vm1, %v5440_v38  ;;  %4782 = vmatprep.mubr.msk.f32.mxu0 %vm238_vm1, %v5119_v14  ;;  %v6676_v14 = vld [vmem:[#allocation4_spill] sm:$0xff] }
  0x95   : > { %4732 = vmatprep.mubr.msk.f32.mxu1 %vm238_vm1, %v5446_v0 }
  0x97   : > { %4783 = vmatmul.mubr.msk.f32.gmra.mxu0 %vm238_vm1, %v5137_v16  ;;  %v6677_v16 = vld [vmem:[#allocation5_spill] sm:$0xff] }
  0x98   : > { %4733 = vmatmul.mubr.msk.f32.gmra.mxu1 %vm238_vm1, %v5460_v2  ;;  %4785 = vmatprep.mubr.msk.f32.mxu0 %vm238_vm1, %v5143_v18  ;;  %v6678_v18 = vld [vmem:[#allocation6_spill] sm:$0xff] }
  0x99   : > { %4735 = vmatprep.mubr.msk.f32.mxu1 %vm238_vm1, %v5466_v60 }
  0x9b   : > { %4786 = vmatmul.mubr.msk.f32.gmra.mxu0 %vm238_vm1, %v5157_v20  ;;  %v6679_v20 = vld [vmem:[#allocation7_spill] sm:$0xff] }
  0x9c   : > { %4736 = vmatmul.mubr.msk.f32.gmra.mxu1 %vm238_vm1, %v5480_v62  ;;  %4788 = vmatprep.mubr.msk.f32.mxu0 %vm238_vm1, %v5163_v22  ;;  %v6680_v22 = vld [vmem:[#allocation8_spill] sm:$0xff] }
  0x9d   : > { %4738 = vmatprep.mubr.msk.f32.mxu1 %vm238_vm1, %v5486_v56 }
  0x9f   : > { %4789 = vmatmul.mubr.msk.f32.gmra.mxu0 %vm238_vm1, %v5177_v24  ;;  %v6681_v24 = vld [vmem:[#allocation9_spill] sm:$0xff] }
  0xa0   : > { %4739 = vmatmul.mubr.msk.f32.gmra.mxu1 %vm238_vm1, %v5500_v58  ;;  %4791 = vmatprep.mubr.msk.f32.mxu0 %vm238_vm1, %v5183_v26  ;;  %v6682_v26 = vld [vmem:[#allocation10_spill] sm:$0xff] }
  0xa1   : > { %4741 = vmatprep.mubr.msk.f32.mxu1 %vm238_vm1, %v5506_v52 }
  0xa3   : > { %4792 = vmatmul.mubr.msk.f32.gmra.mxu0 %vm238_vm1, %v5197_v28  ;;  %v6683_v28 = vld [vmem:[#allocation11_spill] sm:$0xff] }
  0xa4   : > { %4742 = vmatmul.mubr.msk.f32.gmra.mxu1 %vm238_vm1, %v5520_v54  ;;  %4794 = vmatprep.mubr.msk.f32.mxu0 %vm238_vm1, %v5203_v30  ;;  %v6685_v30 = vld [vmem:[#allocation13_spill] sm:$0xff] }
  0xa5   : > { %4744 = vmatprep.mubr.msk.f32.mxu1 %vm238_vm1, %v5526_v48 }
  0xa7   : > { %4795 = vmatmul.mubr.msk.f32.gmra.mxu0 %vm238_vm1, %v5217_v32  ;;  %v6687_v32 = vld [vmem:[#allocation15_spill] sm:$0xff] }
  0xa8   : > { %4745 = vmatmul.mubr.msk.f32.gmra.mxu1 %vm238_vm1, %v5540_v50  ;;  %4797 = vmatprep.mubr.msk.f32.mxu0 %vm238_vm1, %v5223_v34  ;;  %v6689_v34 = vld [vmem:[#allocation17_spill] sm:$0xff] }
  0xa9   : > { %4747 = vmatprep.mubr.msk.f32.mxu1 %vm238_vm1, %v5546_v42 }
  0xab   : > { %4798 = vmatmul.mubr.msk.f32.gmra.mxu0 %vm238_vm1, %v6673_v7 }
  0xac   : > { %4748 = vmatmul.mubr.msk.f32.gmra.mxu1 %vm238_vm1, %v5560_v46  ;;  %4800 = vmatprep.mubr.msk.f32.mxu0 %vm238_vm1, %v5707_v6  ;;  %v4084_v6 = vld [vmem:[%s5071_s23 + $0x198] sm:$0xff] }
  0xad   : > { %4750 = vmatprep.mubr.msk.f32.mxu1 %vm238_vm1, %v5704_v4 }
  0xaf   : > { %4801 = vmatmul.mubr.msk.f32.gmra.mxu0 %vm238_vm1, %v5721_v11  ;;  %v5896_v11 = vld [vmem:[%s5071_s23 + $0x182] sm:$0xff] }
  0xb0   : > { %4751 = vmatmul.mubr.msk.f32.gmra.mxu1 %vm238_vm1, %v5718_v8  ;;  %4855 = vmatprep.mubr.msk.f32.mxu0 %vm238_vm1, %v5282_v47  ;;  %6707 = vst [vmem:[#allocation7_spill] sm:$0xff] %v5896_v11 }
  0xb1   : > { %4805 = vmatprep.mubr.msk.f32.mxu1 %vm238_vm1, %v6675_v12 }
  0xb3   : > { %4856 = vmatmul.mubr.msk.f32.vlgmr.msra.gmra.mxu0 %vm238_vm1, %v5300_v49 }
  0xb4   : > { %4806 = vmatmul.mubr.msk.f32.vlgmr.msra.gmra.mxu1 %vm238_vm1, %v6676_v14  ;;  %4954 = vmatpush3.msk.msra.mxu0 %vm335_vm0, %v5585_v10 }
  0xb5   : > { %4904 = vmatpush3.msk.msra.mxu1 %vm335_vm0, %v5580_v36  ;;  %4808 = vmatprep.mubr.msk.f32.mxu1 %vm238_vm1, %v6677_v16  ;;  %v6691_v36 = vld [vmem:[#allocation19_spill] sm:$0xff] }
  0xb6   : > { %4858 = vmatprep.mubr.msk.f32.mxu0 %vm238_vm1, %v5306_v51 }
  0xb7   : > { %4859 = vmatmul.mubr.msk.f32.gmra.mxu0 %vm238_vm1, %v5320_v53 }
  0xb8   : > { %4809 = vmatmul.mubr.msk.f32.gmra.mxu1 %vm238_vm1, %v6678_v18  ;;  %4861 = vmatprep.mubr.msk.f32.mxu0 %vm238_vm1, %v5326_v55  ;;  %v6694_v55 = vld [vmem:[#allocation22_spill] sm:$0xff] }
  0xb9   : > { %4811 = vmatprep.mubr.msk.f32.mxu1 %vm238_vm1, %v6679_v20 }
  0xbb   : > { %4862 = vmatmul.mubr.msk.f32.gmra.mxu0 %vm238_vm1, %v5340_v57  ;;  %v6695_v57 = vld [vmem:[#allocation23_spill] sm:$0xff] }
  0xbc   : > { %4812 = vmatmul.mubr.msk.f32.gmra.mxu1 %vm238_vm1, %v6680_v22  ;;  %4864 = vmatprep.mubr.msk.f32.mxu0 %vm238_vm1, %v5346_v59 }
  0xbd   : > { %4814 = vmatprep.mubr.msk.f32.mxu1 %vm238_vm1, %v6681_v24 }
  0xbf   : > { %4865 = vmatmul.mubr.msk.f32.gmra.mxu0 %vm238_vm1, %v5360_v61 }
  0xc0   : > { %4815 = vmatmul.mubr.msk.f32.gmra.mxu1 %vm238_vm1, %v6682_v26  ;;  %4867 = vmatprep.mubr.msk.f32.mxu0 %vm238_vm1, %v5366_v63 }
  0xc1   : > { %4817 = vmatprep.mubr.msk.f32.mxu1 %vm238_vm1, %v6683_v28 }
  0xc3   : > { %4868 = vmatmul.mubr.msk.f32.gmra.mxu0 %vm238_vm1, %v5380_v1 }
  0xc4   : > { %4818 = vmatmul.mubr.msk.f32.gmra.mxu1 %vm238_vm1, %v6684_v29  ;;  %4870 = vmatprep.mubr.msk.f32.mxu0 %vm238_vm1, %v5386_v3 }
  0xc5   : > { %4820 = vmatprep.mubr.msk.f32.mxu1 %vm238_vm1, %v6685_v30 }
  0xc7   : > { %4871 = vmatmul.mubr.msk.f32.gmra.mxu0 %vm238_vm1, %v5400_v9 }
  0xc8   : > { %4821 = vmatmul.mubr.msk.f32.gmra.mxu1 %vm238_vm1, %v6686_v31  ;;  %4873 = vmatprep.mubr.msk.f32.mxu0 %vm238_vm1, %v5406_v37 }
  0xc9   : > { %4823 = vmatprep.mubr.msk.f32.mxu1 %vm238_vm1, %v6687_v32 }
  0xcb   : > { %4874 = vmatmul.mubr.msk.f32.gmra.mxu0 %vm238_vm1, %v5420_v39 }
  0xcc   : > { %4824 = vmatmul.mubr.msk.f32.gmra.mxu1 %vm238_vm1, %v6688_v33  ;;  %4876 = vmatprep.mubr.msk.f32.mxu0 %vm238_vm1, %v5426_v5  ;;  %v6698_v5 = vld [vmem:[#allocation26_spill] sm:$0xff] }
  0xcd   : > { %4826 = vmatprep.mubr.msk.f32.mxu1 %vm238_vm1, %v6689_v34 }
  0xcf   : > { %4877 = vmatmul.mubr.msk.f32.gmra.mxu0 %vm238_vm1, %v5440_v38  ;;  %v6701_v38 = vld [vmem:[#allocation28_spill] sm:$0xff] }
  0xd0   : > { %4827 = vmatmul.mubr.msk.f32.gmra.mxu1 %vm238_vm1, %v6690_v35  ;;  %4879 = vmatprep.mubr.msk.f32.mxu0 %vm238_vm1, %v5446_v0  ;;  %v6696_v0 = vld [vmem:[#allocation24_spill] sm:$0xff] }
  0xd1   : > { %4829 = vmatprep.mubr.msk.f32.mxu1 %vm238_vm1, %v6691_v36 }
  0xd3   : > { %v5799_v41 = vpop.f32.mrf.mxu0  ;;  %4880 = vmatmul.mubr.msk.f32.gmra.mxu0 %vm238_vm1, %v5460_v2 }
  0xd4   : > { %v5801_v43 = vpop.f32.mrf.mxu1  ;;  %4830 = vmatmul.mubr.msk.f32.gmra.mxu1 %vm238_vm1, %v6692_v44  ;;  %4882 = vmatprep.mubr.msk.f32.mxu0 %vm238_vm1, %v5466_v60 }
  0xd5   : > { %4832 = vmatprep.mubr.msk.f32.mxu1 %vm238_vm1, %v6693_v45  ;;  %v5811_v47 = vpop.f32.mrf.mxu0 }
  0xd6   : > { %v5813_v49 = vpop.f32.mrf.mxu1 }
  0xd7   : > { %v5815_v51 = vpop.f32.mrf.mxu0  ;;  %4883 = vmatmul.mubr.msk.f32.gmra.mxu0 %vm238_vm1, %v5480_v62  ;;  %v6697_v62 = vld [vmem:[#allocation25_spill] sm:$0xff] }
  0xd8   : > { %v5817_v53 = vpop.f32.mrf.mxu1  ;;  %4833 = vmatmul.mubr.msk.f32.gmra.mxu1 %vm238_vm1, %v6694_v55  ;;  %4885 = vmatprep.mubr.msk.f32.mxu0 %vm238_vm1, %v5486_v56 }
  0xd9   : > { %4835 = vmatprep.mubr.msk.f32.mxu1 %vm238_vm1, %v6695_v57  ;;  %v5827_v59 = vpop.f32.mrf.mxu0 }
  0xda   : > { %v5829_v60 = vpop.f32.mrf.mxu1 }
  0xdb   : > { %v5831_v61 = vpop.f32.mrf.mxu0  ;;  %4886 = vmatmul.mubr.msk.f32.gmra.mxu0 %vm238_vm1, %v5500_v58  ;;  %v6699_v58 = vld [vmem:[#allocation27_spill] sm:$0xff] }
  0xdc   : > { %v5833_v63 = vpop.f32.mrf.mxu1  ;;  %4836 = vmatmul.mubr.msk.f32.gmra.mxu1 %vm238_vm1, %v6696_v0  ;;  %4888 = vmatprep.mubr.msk.f32.mxu0 %vm238_vm1, %v5506_v52 }
  0xdd   : > { %4838 = vmatprep.mubr.msk.f32.mxu1 %vm238_vm1, %v6697_v62  ;;  %v5843_v56 = vpop.f32.mrf.mxu0 }
  0xde   : > { %v5845_v1 = vpop.f32.mrf.mxu1 }
  0xdf   : > { %v5847_v2 = vpop.f32.mrf.mxu0  ;;  %4889 = vmatmul.mubr.msk.f32.gmra.mxu0 %vm238_vm1, %v5520_v54  ;;  %v6702_v54 = vld [vmem:[#allocation29_spill] sm:$0xff] }
  0xe0   : > { %v5849_v3 = vpop.f32.mrf.mxu1  ;;  %4839 = vmatmul.mubr.msk.f32.gmra.mxu1 %vm238_vm1, %v6698_v5  ;;  %4891 = vmatprep.mubr.msk.f32.mxu0 %vm238_vm1, %v5526_v48 }
  0xe1   : > { %4841 = vmatprep.mubr.msk.f32.mxu1 %vm238_vm1, %v6699_v58  ;;  %v5859_v52 = vpop.f32.mrf.mxu0 }
  0xe2   : > { %v5861_v9 = vpop.f32.mrf.mxu1 }
  0xe3   : > { %v5863_v10 = vpop.f32.mrf.mxu0  ;;  %4892 = vmatmul.mubr.msk.f32.gmra.mxu0 %vm238_vm1, %v5540_v50  ;;  %v6705_v50 = vld [vmem:[#allocation31_spill] sm:$0xff] }
  0xe4   : > { %v5865_v37 = vpop.f32.mrf.mxu1  ;;  %4842 = vmatmul.mubr.msk.f32.gmra.mxu1 %vm238_vm1, %v6701_v38  ;;  %4894 = vmatprep.mubr.msk.f32.mxu0 %vm238_vm1, %v5546_v42 }
  0xe5   : > { %6700 = vst [vmem:[#allocation3_spill] sm:$0xff] %v5865_v37  ;;  %4844 = vmatprep.mubr.msk.f32.mxu1 %vm238_vm1, %v6702_v54  ;;  %v5875_v48 = vpop.f32.mrf.mxu0  ;;  %v6709_v37 = vld [vmem:[#allocation32_spill] sm:$0xff] }
  0xe6   : > { %v5877_v39 = vpop.f32.mrf.mxu1 }
  0xe7   : > { %6703 = vst [vmem:[#allocation4_spill] sm:$0xff] %v5877_v39  ;;  %v5879_v7 = vpop.f32.mrf.mxu0  ;;  %4895 = vmatmul.mubr.msk.f32.gmra.mxu0 %vm238_vm1, %v5560_v46  ;;  %v5911_v46 = vld [vmem:[%s5071_s23 + $0x18a] sm:$0xff] }
  0xe8   : > { %v5881_v12 = vpop.f32.mrf.mxu1  ;;  %4845 = vmatmul.mubr.msk.f32.gmra.mxu1 %vm238_vm1, %v5543_v40  ;;  %4897 = vmatprep.mubr.msk.f32.mxu0 %vm238_vm1, %v5704_v4  ;;  %6710 = vst [vmem:[#allocation9_spill] sm:$0xff] %v5911_v46  ;;  %v4085_v4 = vld [vmem:[%s5071_s23 + $0x1a0] sm:$0xff] }
  0xe9   : > { %6704 = vst [vmem:[#allocation5_spill] sm:$0xff] %v5881_v12  ;;  %4847 = vmatprep.mubr.msk.f32.mxu1 %vm238_vm1, %v6705_v50  ;;  %v5891_v42 = vpop.f32.mrf.mxu0 }
  0xea   : > { %v5893_v14 = vpop.f32.mrf.mxu1 }
  0xeb   : > { %6706 = vst [vmem:[#allocation6_spill] sm:$0xff] %v5893_v14  ;;  %v5899_v12 = vpop.f32.mrf.mxu0  ;;  %4898 = vmatmul.mubr.msk.f32.gmra.mxu0 %vm238_vm1, %v5718_v8 }
  0xec   : > { %v5901_v39 = vpop.f32.mrf.mxu1  ;;  %4848 = vmatmul.mubr.msk.f32.gmra.mxu1 %vm238_vm1, %v6709_v37  ;;  %4900 = vmatprep.mubr.msk.f32.mxu0 %vm238_vm1, %v4084_v6 }
  0xed   : > { %6708 = vst [vmem:[#allocation8_spill] sm:$0xff] %v5901_v39  ;;  %4850 = vmatprep.mubr.msk.f32.mxu1 %vm238_vm1, %v5896_v11  ;;  %v5914_v50 = vpop.f32.mrf.mxu0 }
  0xee   : > { %v5916_v14 = vpop.f32.mrf.mxu1 }
  0xef   : > { %6711 = vst [vmem:[#allocation10_spill] sm:$0xff] %v5916_v14  ;;  %v5918_v40 = vpop.f32.mrf.mxu0  ;;  %4901 = vmatmul.mubr.msk.f32.gmra.mxu0 %vm238_vm1, %v4085_v4 }
  0xf0   : > { %v5920_v39 = vpop.f32.mrf.mxu1  ;;  %4851 = vmatmul.mubr.msk.f32.gmra.mxu1 %vm238_vm1, %v5911_v46  ;;  %4955 = vmatprep.mubr.msk.f32.mxu0 %vm238_vm1, %v6677_v16 }
  0xf1   : > { %6712 = vst [vmem:[#allocation11_spill] sm:$0xff] %v5920_v39  ;;  %4905 = vmatprep.mubr.msk.f32.mxu1 %vm238_vm1, %v5116_v13  ;;  %v5929_v6 = vpop.f32.mrf.mxu0 }
  0xf2   : > { %v5931_v8 = vpop.f32.mrf.mxu1 }
  0xf3   : > { %6713 = vst [vmem:[#allocation12_spill] sm:$0xff] %v5931_v8  ;;  %v4657_v14 = vpop.f32.mrf.mxu0  ;;  %4956 = vmatmul.mubr.msk.f32.vlgmr.msra.gmra.mxu0 %vm238_vm1, %v6678_v18 }
  0xf4   : > { %v4607_v37 = vpop.f32.mrf.mxu1  ;;  %4906 = vmatmul.mubr.msk.f32.vlgmr.msra.gmra.mxu1 %vm238_vm1, %v5134_v15  ;;  %4958 = vmatprep.mubr.msk.f32.mxu0 %vm238_vm1, %v6679_v20 }
  0xf5   : > { %v735_v4 = vadd.f32 %v4607_v37, %v5799_v41  ;;  %4908 = vmatprep.mubr.msk.f32.mxu1 %vm238_vm1, %v5140_v17  ;;  %v1087_v16 = vpop.f32.mrf.mxu0  ;;  %v4130_v37 = vld [vmem:[%s5071_s23 + $0xa9] sm:$0xff] }
  0xf6   : > { %v729_v13 = vpop.f32.mrf.mxu1 }
  0xf7   : > { %v5942_v39 = vadd.f32 %v4657_v14, %v735_v4  ;;  %v730_v8 = vadd.f32 %v729_v13, %v5811_v47  ;;  %v4660_v11 = vpop.f32.mrf.mxu0  ;;  %4959 = vmatmul.mubr.msk.f32.gmra.mxu0 %vm238_vm1, %v6680_v22 }
  0xf8   : > { %v4610_v46 = vpop.f32.mrf.mxu1  ;;  %4909 = vmatmul.mubr.msk.f32.gmra.mxu1 %vm238_vm1, %v5154_v19  ;;  %4961 = vmatprep.mubr.msk.f32.mxu0 %vm238_vm1, %v6681_v24 }
  0xf9   : > { %v5949_v15 = vadd.f32 %v1087_v16, %v730_v8  ;;  %v745_v17 = vadd.f32 %v4610_v46, %v5815_v51  ;;  %4911 = vmatprep.mubr.msk.f32.mxu1 %vm238_vm1, %v5160_v21  ;;  %v1097_v20 = vpop.f32.mrf.mxu0  ;;  %v4128_v51 = vld [vmem:[%s5071_s23 + $0x91] sm:$0xff] }
  0xfa   : > { %v739_v18 = vpop.f32.mrf.mxu1  ;;  %v4131_v16 = vld [vmem:[%s5071_s23 + $0xb1] sm:$0xff] }
  0xfb   : > { %v5956_v41 = vadd.f32 %v4660_v11, %v745_v17  ;;  %v740_v19 = vadd.f32 %v739_v18, %v5827_v59  ;;  %v4663_v14 = vpop.f32.mrf.mxu0  ;;  %4962 = vmatmul.mubr.msk.f32.gmra.mxu0 %vm238_vm1, %v6682_v26  ;;  %v4132_v18 = vld [vmem:[%s5071_s23 + $0xc1] sm:$0xff] }
  0xfc   : > { %v4613_v47 = vpop.f32.mrf.mxu1  ;;  %4912 = vmatmul.mubr.msk.f32.gmra.mxu1 %vm238_vm1, %v5174_v23  ;;  %4964 = vmatprep.mubr.msk.f32.mxu0 %vm238_vm1, %v6683_v28 }
  0xfd   : > { %v5963_v22 = vadd.f32 %v1097_v20, %v740_v19  ;;  %v755_v21 = vadd.f32 %v4613_v47, %v5831_v61  ;;  %4914 = vmatprep.mubr.msk.f32.mxu1 %vm238_vm1, %v5180_v25  ;;  %v1107_v24 = vpop.f32.mrf.mxu0  ;;  %v4129_v61 = vld [vmem:[%s5071_s23 + $0x99] sm:$0xff] }
  0xfe   : > { %v749_v11 = vpop.f32.mrf.mxu1 }
  0xff   : > { %v5971_v59 = vadd.f32 %v4663_v14, %v755_v21  ;;  %v750_v23 = vadd.f32 %v749_v11, %v5843_v56  ;;  %v4666_v46 = vpop.f32.mrf.mxu0  ;;  %4965 = vmatmul.mubr.msk.f32.gmra.mxu0 %vm238_vm1, %v6684_v29  ;;  %v4133_v14 = vld [vmem:[%s5071_s23 + $0xc9] sm:$0xff]  ;;  %v4134_v11 = vld [vmem:[%s5071_s23 + $0xd9] sm:$0xff] }
 0x100   : > { %v4616_v26 = vpop.f32.mrf.mxu1  ;;  %4915 = vmatmul.mubr.msk.f32.gmra.mxu1 %vm238_vm1, %v5194_v27  ;;  %4967 = vmatprep.mubr.msk.f32.mxu0 %vm238_vm1, %v6685_v30 }
 0x101   : > { %v5978_v25 = vadd.f32 %v1107_v24, %v750_v23  ;;  %v765_v28 = vadd.f32 %v4616_v26, %v5847_v2  ;;  %4917 = vmatprep.mubr.msk.f32.mxu1 %vm238_vm1, %v4128_v51  ;;  %v1117_v8 = vpop.f32.mrf.mxu0  ;;  %v4135_v26 = vld [vmem:[%s5071_s23 + $0xe1] sm:$0xff] }
 0x102   : > { %v759_v56 = vpop.f32.mrf.mxu1 }
 0x103   : > { %v5986_v4 = vadd.f32 %v4666_v46, %v765_v28  ;;  %v760_v27 = vadd.f32 %v759_v56, %v5859_v52  ;;  %v4669_v13 = vpop.f32.mrf.mxu0  ;;  %4968 = vmatmul.mubr.msk.f32.gmra.mxu0 %vm238_vm1, %v6686_v31  ;;  %v4136_v28 = vld [vmem:[%s5071_s23 + $0xf1] sm:$0xff] }
 0x104   : > { %v4619_v29 = vpop.f32.mrf.mxu1  ;;  %4918 = vmatmul.mubr.msk.f32.gmra.mxu1 %vm238_vm1, %v4129_v61  ;;  %4970 = vmatprep.mubr.msk.f32.mxu0 %vm238_vm1, %v6687_v32 }
 0x105   : > { %v5992_v2 = vadd.f32 %v1117_v8, %v760_v27  ;;  %v775_v30 = vadd.f32 %v4619_v29, %v5863_v10  ;;  %4920 = vmatprep.mubr.msk.f32.mxu1 %vm238_vm1, %v4130_v37  ;;  %v1127_v52 = vpop.f32.mrf.mxu0  ;;  %v4137_v37 = vld [vmem:[%s5071_s23 + $0xf9] sm:$0xff]  ;;  %v4138_v29 = vld [vmem:[%s5071_s23 + $0x109] sm:$0xff] }
 0x106   : > { %v769_v17 = vpop.f32.mrf.mxu1 }
 0x107   : > { %v6000_v20 = vadd.f32 %v4669_v13, %v775_v30  ;;  %v770_v19 = vadd.f32 %v769_v17, %v5875_v48  ;;  %v4672_v47 = vpop.f32.mrf.mxu0  ;;  %4971 = vmatmul.mubr.msk.f32.gmra.mxu0 %vm238_vm1, %v6688_v33  ;;  %v4139_v17 = vld [vmem:[%s5071_s23 + $0x111] sm:$0xff] }
 0x108   : > { %v4622_v31 = vpop.f32.mrf.mxu1  ;;  %4921 = vmatmul.mubr.msk.f32.gmra.mxu1 %vm238_vm1, %v4131_v16  ;;  %4973 = vmatprep.mubr.msk.f32.mxu0 %vm238_vm1, %v6689_v34 }
 0x109   : > { %v6006_v10 = vadd.f32 %v1127_v52, %v770_v19  ;;  %v785_v32 = vadd.f32 %v4622_v31, %v5879_v7  ;;  %4923 = vmatprep.mubr.msk.f32.mxu1 %vm238_vm1, %v4132_v18  ;;  %v1137_v48 = vpop.f32.mrf.mxu0  ;;  %v4140_v18 = vld [vmem:[%s5071_s23 + $0x121] sm:$0xff] }
 0x10a   : > { %v779_v21 = vpop.f32.mrf.mxu1 }
 0x10b   : > { %v6014_v24 = vadd.f32 %v4672_v47, %v785_v32  ;;  %v780_v51 = vadd.f32 %v779_v21, %v5891_v42  ;;  %v4675_v23 = vpop.f32.mrf.mxu0  ;;  %4974 = vmatmul.mubr.msk.f32.gmra.mxu0 %vm238_vm1, %v6690_v35  ;;  %v4141_v32 = vld [vmem:[%s5071_s23 + $0x129] sm:$0xff]  ;;  %v4142_v21 = vld [vmem:[%s5071_s23 + $0x139] sm:$0xff] }
 0x10c   : > { %v4625_v33 = vpop.f32.mrf.mxu1  ;;  %4924 = vmatmul.mubr.msk.f32.gmra.mxu1 %vm238_vm1, %v4133_v14  ;;  %4976 = vmatprep.mubr.msk.f32.mxu0 %vm238_vm1, %v6691_v36 }
 0x10d   : > { %v6020_v7 = vadd.f32 %v1137_v48, %v780_v51  ;;  %v795_v34 = vadd.f32 %v4625_v33, %v5899_v12  ;;  %4926 = vmatprep.mubr.msk.f32.mxu1 %vm238_vm1, %v4134_v11  ;;  %v1147_v42 = vpop.f32.mrf.mxu0  ;;  %v4143_v33 = vld [vmem:[%s5071_s23 + $0x141] sm:$0xff] }
 0x10e   : > { %v789_v46 = vpop.f32.mrf.mxu1 }
 0x10f   : > { %v6028_v61 = vadd.f32 %v4675_v23, %v795_v34  ;;  %v790_v56 = vadd.f32 %v789_v46, %v5914_v50  ;;  %v4678_v8 = vpop.f32.mrf.mxu0  ;;  %4977 = vmatmul.mubr.msk.f32.gmra.mxu0 %vm238_vm1, %v6692_v44  ;;  %v4144_v34 = vld [vmem:[%s5071_s23 + $0x151] sm:$0xff] }
 0x110   : > { %v4628_v35 = vpop.f32.mrf.mxu1  ;;  %4927 = vmatmul.mubr.msk.f32.gmra.mxu1 %vm238_vm1, %v4135_v26  ;;  %4979 = vmatprep.mubr.msk.f32.mxu0 %vm238_vm1, %v6693_v45 }
 0x111   : > { %v6034_v12 = vadd.f32 %v1147_v42, %v790_v56  ;;  %v805_v36 = vadd.f32 %v4628_v35, %v5918_v40  ;;  %4929 = vmatprep.mubr.msk.f32.mxu1 %vm238_vm1, %v4136_v28  ;;  %v1157_v50 = vpop.f32.mrf.mxu0  ;;  %v4145_v28 = vld [vmem:[%s5071_s23 + $0x159] sm:$0xff]  ;;  %v4146_v35 = vld [vmem:[%s5071_s23 + $0x169] sm:$0xff] }
 0x112   : > { %v799_v27 = vpop.f32.mrf.mxu1 }
 0x113   : > { %v6042_v13 = vadd.f32 %v4678_v8, %v805_v36  ;;  %v800_v30 = vadd.f32 %v799_v27, %v5929_v6  ;;  %v4681_v16 = vpop.f32.mrf.mxu0  ;;  %4980 = vmatmul.mubr.msk.f32.gmra.mxu0 %vm238_vm1, %v6694_v55  ;;  %v4212_v8 = vld [vmem:[%s5071_s23 + $0x16a] sm:$0xff] }
 0x114   : > { %v4631_v44 = vpop.f32.mrf.mxu1  ;;  %4930 = vmatmul.mubr.msk.f32.gmra.mxu1 %vm238_vm1, %v4137_v37  ;;  %4982 = vmatprep.mubr.msk.f32.mxu0 %vm238_vm1, %v6695_v57 }
 0x115   : > { %v6048_v40 = vadd.f32 %v1157_v50, %v800_v30  ;;  %v815_v45 = vadd.f32 %v4631_v44, %v5801_v43  ;;  %4932 = vmatprep.mubr.msk.f32.mxu1 %vm238_vm1, %v4138_v29  ;;  %v1167_v6 = vpop.f32.mrf.mxu0  ;;  %v4147_v30 = vld [vmem:[%s5071_s23 + $0x171] sm:$0xff] }
 0x116   : > { %v809_v52 = vpop.f32.mrf.mxu1  ;;  %v4213_v44 = vld [vmem:[%s5071_s23 + $0x172] sm:$0xff] }
 0x117   : > { %v6056_v19 = vadd.f32 %v4681_v16, %v815_v45  ;;  %v810_v31 = vadd.f32 %v809_v52, %v5813_v49  ;;  %v4684_v47 = vpop.f32.mrf.mxu0  ;;  %4983 = vmatmul.mubr.msk.f32.gmra.mxu0 %vm238_vm1, %v6696_v0 }
 0x118   : > { %v4634_v55 = vpop.f32.mrf.mxu1  ;;  %4933 = vmatmul.mubr.msk.f32.gmra.mxu1 %vm238_vm1, %v4139_v17  ;;  %4985 = vmatprep.mubr.msk.f32.mxu0 %vm238_vm1, %v6697_v62  ;;  %v6716_v17 = vld [vmem:[#allocation4_spill] sm:$0xff] }
 0x119   : > { %v6062_v43 = vadd.f32 %v1167_v6, %v810_v31  ;;  %v825_v57 = vadd.f32 %v4634_v55, %v5817_v53  ;;  %4935 = vmatprep.mubr.msk.f32.mxu1 %vm238_vm1, %v4140_v18  ;;  %v1177_v49 = vpop.f32.mrf.mxu0  ;;  %v6717_v55 = vld [vmem:[#allocation5_spill] sm:$0xff] }
 0x11a   : > { %v819_v14 = vpop.f32.mrf.mxu1 }
 0x11b   : > { %v6070_v48 = vadd.f32 %v4684_v47, %v825_v57  ;;  %v820_v11 = vadd.f32 %v819_v14, %v5829_v60  ;;  %v4687_v51 = vpop.f32.mrf.mxu0  ;;  %4986 = vmatmul.mubr.msk.f32.gmra.mxu0 %vm238_vm1, %v6698_v5  ;;  %v6718_v57 = vld [vmem:[#allocation33_spill] sm:$0xff] }
 0x11c   : > { %v4637_v0 = vpop.f32.mrf.mxu1  ;;  %4936 = vmatmul.mubr.msk.f32.gmra.mxu1 %vm238_vm1, %v4141_v32  ;;  %4988 = vmatprep.mubr.msk.f32.mxu0 %vm238_vm1, %v6699_v58  ;;  %v6719_v32 = vld [vmem:[#allocation7_spill] sm:$0xff] }
 0x11d   : > { %v6076_v53 = vadd.f32 %v1177_v49, %v820_v11  ;;  %v835_v62 = vadd.f32 %v4637_v0, %v5833_v63  ;;  %4938 = vmatprep.mubr.msk.f32.mxu1 %vm238_vm1, %v4142_v21  ;;  %v1187_v60 = vpop.f32.mrf.mxu0  ;;  %v4150_v21 = vld [vmem:[%s5071_s23 + $0x199] sm:$0xff] }
 0x11e   : > { %v829_v23 = vpop.f32.mrf.mxu1  ;;  %v4216_v11 = vld [vmem:[%s5071_s23 + $0x19a] sm:$0xff] }
 0x11f   : > { %v6084_v26 = vadd.f32 %v4687_v51, %v835_v62  ;;  %v830_v5 = vadd.f32 %v829_v23, %v5845_v1  ;;  %v4690_v42 = vpop.f32.mrf.mxu0  ;;  %4989 = vmatmul.mubr.msk.f32.gmra.mxu0 %vm238_vm1, %v6701_v38  ;;  %v6720_v51 = vld [vmem:[#allocation6_spill] sm:$0xff] }
 0x120   : > { %v4640_v46 = vpop.f32.mrf.mxu1  ;;  %4939 = vmatmul.mubr.msk.f32.gmra.mxu1 %vm238_vm1, %v4143_v33  ;;  %4991 = vmatprep.mubr.msk.f32.mxu0 %vm238_vm1, %v6702_v54  ;;  %v6715_v54 = vld [vmem:[#allocation3_spill] sm:$0xff] }
 0x121   : > { %v6090_v63 = vadd.f32 %v1187_v60, %v830_v5  ;;  %v845_v58 = vadd.f32 %v4640_v46, %v5849_v3  ;;  %4941 = vmatprep.mubr.msk.f32.mxu1 %vm238_vm1, %v4144_v34  ;;  %v1197_v56 = vpop.f32.mrf.mxu0  ;;  %v6714_v3 = vld [vmem:[#allocation30_spill] sm:$0xff]  ;;  %v6722_v34 = vld [vmem:[#allocation9_spill] sm:$0xff]  ;;  %v6723_v46 = vld [vmem:[#allocation8_spill] sm:$0xff] }
 0x122   : > { %v839_v1 = vpop.f32.mrf.mxu1  ;;  %v6721_v60 = vld [vmem:[#allocation2_spill] sm:$0xff] }
 0x123   : > { %v6099_v36 = vadd.f32 %v4690_v42, %v845_v58  ;;  %v840_v38 = vadd.f32 %v839_v1, %v5861_v9  ;;  %v4693_v27 = vpop.f32.mrf.mxu0  ;;  %4992 = vmatmul.mubr.msk.f32.gmra.mxu0 %vm238_vm1, %v6714_v3  ;;  %v4151_v58 = vld [vmem:[%s5071_s23 + $0x1a1] sm:$0xff] }
 0x124   : > { %v4643_v37 = vpop.f32.mrf.mxu1  ;;  %4942 = vmatmul.mubr.msk.f32.gmra.mxu1 %vm238_vm1, %v4145_v28  ;;  %4994 = vmatprep.mubr.msk.f32.mxu0 %vm238_vm1, %v4212_v8  ;;  %v4217_v28 = vld [vmem:[%s5071_s23 + $0x1a2] sm:$0xff] }
 0x125   : > { %v6105_v50 = vadd.f32 %v1197_v56, %v840_v38  ;;  %v855_v29 = vadd.f32 %v4643_v37, %v6715_v54  ;;  %4944 = vmatprep.mubr.msk.f32.mxu1 %vm238_vm1, %v4146_v35  ;;  %v1207_v16 = vpop.f32.mrf.mxu0  ;;  %v6724_v8 = vld [vmem:[#allocation10_spill] sm:$0xff]  ;;  %v6725_v54 = vld [vmem:[#allocation11_spill] sm:$0xff] }
 0x126   : > { %v849_v9 = vpop.f32.mrf.mxu1 }
 0x127   : > { %v6112_v45 = vadd.f32 %v4693_v27, %v855_v29  ;;  %v850_v52 = vadd.f32 %v849_v9, %v6716_v17  ;;  %v4696_v18 = vpop.f32.mrf.mxu0  ;;  %4995 = vmatmul.mubr.msk.f32.gmra.mxu0 %vm238_vm1, %v4213_v44 }
 0x128   : > { %v4646_v6 = vpop.f32.mrf.mxu1  ;;  %4945 = vmatmul.mubr.msk.f32.gmra.mxu1 %vm238_vm1, %v4147_v30  ;;  %4997 = vmatprep.mubr.msk.f32.mxu0 %vm238_vm1, %v6719_v32 }
 0x129   : > { %v6117_v31 = vadd.f32 %v1207_v16, %v850_v52  ;;  %v865_v47 = vadd.f32 %v4646_v6, %v6717_v55  ;;  %4947 = vmatprep.mubr.msk.f32.mxu1 %vm238_vm1, %v6718_v57  ;;  %v1217_v49 = vpop.f32.mrf.mxu0  ;;  %v6726_v16 = vld [vmem:[#allocation12_spill] sm:$0xff] }
 0x12a   : > { %v859_v14 = vpop.f32.mrf.mxu1 }
 0x12b   : > { %v6126_v0 = vadd.f32 %v4696_v18, %v865_v47  ;;  %v860_v62 = vadd.f32 %v859_v14, %v6720_v51  ;;  %v4699_v23 = vpop.f32.mrf.mxu0  ;;  %4998 = vmatmul.mubr.msk.f32.gmra.mxu0 %vm238_vm1, %v6722_v34 }
 0x12c   : > { %v4649_v33 = vpop.f32.mrf.mxu1  ;;  %4948 = vmatmul.mubr.msk.f32.gmra.mxu1 %vm238_vm1, %v6721_v60  ;;  %5000 = vmatprep.mubr.msk.f32.mxu0 %vm238_vm1, %v4216_v11 }
 0x12d   : > { %v6133_v5 = vadd.f32 %v1217_v49, %v860_v62  ;;  %v875_v42 = vadd.f32 %v4649_v33, %v6723_v46  ;;  %4950 = vmatprep.mubr.msk.f32.mxu1 %vm238_vm1, %v4150_v21  ;;  %v1227_v56 = vpop.f32.mrf.mxu0 }
 0x12e   : > { %v869_v1 = vpop.f32.mrf.mxu1 }
 0x12f   : > { %v6140_v35 = vadd.f32 %v4699_v23, %v875_v42  ;;  %v870_v38 = vadd.f32 %v869_v1, %v6724_v8  ;;  %v4702_v27 = vpop.f32.mrf.mxu0  ;;  %5001 = vmatmul.mubr.msk.f32.gmra.mxu0 %vm238_vm1, %v4217_v28 }
 0x130   : > { %v4652_v37 = vpop.f32.mrf.mxu1  ;;  %4951 = vmatmul.mubr.msk.f32.gmra.mxu1 %vm238_vm1, %v4151_v58 }
 0x131   : > { %v6145_v3 = vadd.f32 %v1227_v56, %v870_v38  ;;  %v885_v29 = vadd.f32 %v4652_v37, %v6725_v54  ;;  %v1237_v44 = vpop.f32.mrf.mxu0 }
 0x132   : > { %v879_v30 = vpop.f32.mrf.mxu1 }
 0x133   : > { %v6148_v9 = vadd.f32 %v4702_v27, %v885_v29  ;;  %v880_v17 = vadd.f32 %v879_v30, %v6726_v16  ;;  %v4757_v6 = vpop.f32.mrf.mxu0 }
 0x134   : > { %v4707_v52 = vpop.f32.mrf.mxu1 }
 0x135   : > { %v6151_v18 = vadd.f32 %v1237_v44, %v880_v17  ;;  %v1638_v55 = vadd.f32 %v4707_v52, %v5942_v39  ;;  %v1868_v57 = vpop.f32.mrf.mxu0 }
 0x136   : > { %v1478_v47 = vpop.f32.mrf.mxu1 }
 0x137   : > { %v6154_v32 = vadd.f32 %v4757_v6, %v1638_v55  ;;  %v1637_v14 = vadd.f32 %v1478_v47, %v5949_v15  ;;  %v4760_v21 = vpop.f32.mrf.mxu0 }
 0x138   : > { %v4710_v49 = vpop.f32.mrf.mxu1 }
 0x139   : > { %v6157_v11 = vadd.f32 %v1868_v57, %v1637_v14  ;;  %v1640_v51 = vadd.f32 %v4710_v49, %v5956_v41  ;;  %v1878_v33 = vpop.f32.mrf.mxu0 }
 0x13a   : > { %v1488_v62 = vpop.f32.mrf.mxu1 }
 0x13b   : > { %v6160_v23 = vadd.f32 %v4760_v21, %v1640_v51  ;;  %v1639_v60 = vadd.f32 %v1488_v62, %v5963_v22  ;;  %v4763_v39 = vpop.f32.mrf.mxu0 }
 0x13c   : > { %v4713_v34 = vpop.f32.mrf.mxu1 }
 0x13d   : > { %v6163_v46 = vadd.f32 %v1878_v33, %v1639_v60  ;;  %v1642_v42 = vadd.f32 %v4713_v34, %v5971_v59  ;;  %v1888_v15 = vpop.f32.mrf.mxu0 }
 0x13e   : > { %v1498_v58 = vpop.f32.mrf.mxu1 }
 0x13f   : > { %v6166_v28 = vadd.f32 %v4763_v39, %v1642_v42  ;;  %v1641_v1 = vadd.f32 %v1498_v58, %v5978_v25  ;;  %v4766_v41 = vpop.f32.mrf.mxu0 }
 0x140   : > { %v4716_v56 = vpop.f32.mrf.mxu1 }
 0x141   : > { %v6169_v8 = vadd.f32 %v1888_v15, %v1641_v1  ;;  %v1644_v38 = vadd.f32 %v4716_v56, %v5986_v4  ;;  %v1898_v22 = vpop.f32.mrf.mxu0 }
 0x142   : > { %v1508_v37 = vpop.f32.mrf.mxu1 }
 0x143   : > { %v6172_v27 = vadd.f32 %v4766_v41, %v1644_v38  ;;  %v1643_v54 = vadd.f32 %v1508_v37, %v5992_v2  ;;  %v4769_v59 = vpop.f32.mrf.mxu0 }
 0x144   : > { %v4719_v29 = vpop.f32.mrf.mxu1 }
 0x145   : > { %v6175_v30 = vadd.f32 %v1898_v22, %v1643_v54  ;;  %v1646_v44 = vadd.f32 %v4719_v29, %v6000_v20  ;;  %v1908_v25 = vpop.f32.mrf.mxu0 }
 0x146   : > { %v1518_v16 = vpop.f32.mrf.mxu1 }
 0x147   : > { %v6178_v17 = vadd.f32 %v4769_v59, %v1646_v44  ;;  %v1645_v52 = vadd.f32 %v1518_v16, %v6006_v10  ;;  %v4772_v4 = vpop.f32.mrf.mxu0 }
 0x148   : > { %v4722_v6 = vpop.f32.mrf.mxu1 }
 0x149   : > { %v6181_v55 = vadd.f32 %v1908_v25, %v1645_v52  ;;  %v1648_v47 = vadd.f32 %v4722_v6, %v6014_v24  ;;  %v1918_v2 = vpop.f32.mrf.mxu0 }
 0x14a   : > { %v1528_v57 = vpop.f32.mrf.mxu1 }
 0x14b   : > { %v6184_v14 = vadd.f32 %v4772_v4, %v1648_v47  ;;  %v1647_v49 = vadd.f32 %v1528_v57, %v6020_v7  ;;  %v4775_v20 = vpop.f32.mrf.mxu0 }
 0x14c   : > { %v4725_v21 = vpop.f32.mrf.mxu1 }
 0x14d   : > { %v6187_v51 = vadd.f32 %v1918_v2, %v1647_v49  ;;  %v1650_v62 = vadd.f32 %v4725_v21, %v6028_v61  ;;  %v1928_v10 = vpop.f32.mrf.mxu0 }
 0x14e   : > { %v1538_v33 = vpop.f32.mrf.mxu1 }
 0x14f   : > { %v6190_v60 = vadd.f32 %v4775_v20, %v1650_v62  ;;  %v1649_v34 = vadd.f32 %v1538_v33, %v6034_v12  ;;  %v4778_v24 = vpop.f32.mrf.mxu0 }
 0x150   : > { %v4728_v39 = vpop.f32.mrf.mxu1 }
 0x151   : > { %v6193_v42 = vadd.f32 %v1928_v10, %v1649_v34  ;;  %v1652_v58 = vadd.f32 %v4728_v39, %v6042_v13  ;;  %v1938_v7 = vpop.f32.mrf.mxu0 }
 0x152   : > { %v1548_v15 = vpop.f32.mrf.mxu1 }
 0x153   : > { %v6196_v1 = vadd.f32 %v4778_v24, %v1652_v58  ;;  %v1651_v56 = vadd.f32 %v1548_v15, %v6048_v40  ;;  %v4781_v61 = vpop.f32.mrf.mxu0 }
 0x154   : > { %v4731_v41 = vpop.f32.mrf.mxu1 }
 0x155   : > { %v6199_v38 = vadd.f32 %v1938_v7, %v1651_v56  ;;  %v1654_v37 = vadd.f32 %v4731_v41, %v6056_v19  ;;  %v1948_v12 = vpop.f32.mrf.mxu0 }
 0x156   : > { %v1558_v22 = vpop.f32.mrf.mxu1 }
 0x157   : > { %v6202_v54 = vadd.f32 %v4781_v61, %v1654_v37  ;;  %v1653_v29 = vadd.f32 %v1558_v22, %v6062_v43  ;;  %v4784_v13 = vpop.f32.mrf.mxu0 }
 0x158   : > { %v4734_v59 = vpop.f32.mrf.mxu1 }
 0x159   : > { %v6205_v44 = vadd.f32 %v1948_v12, %v1653_v29  ;;  %v1656_v16 = vadd.f32 %v4734_v59, %v6070_v48  ;;  %v1958_v40 = vpop.f32.mrf.mxu0 }
 0x15a   : > { %v1568_v25 = vpop.f32.mrf.mxu1 }
 0x15b   : > { %v6208_v52 = vadd.f32 %v4784_v13, %v1656_v16  ;;  %v1655_v6 = vadd.f32 %v1568_v25, %v6076_v53  ;;  %v4787_v19 = vpop.f32.mrf.mxu0 }
 0x15c   : > { %v4737_v4 = vpop.f32.mrf.mxu1 }
 0x15d   : > { %6727 = vst [vmem:[#allocation13_spill] sm:$0xff] %v6208_v52  ;;  %v6211_v47 = vadd.f32 %v1958_v40, %v1655_v6  ;;  %v1658_v57 = vadd.f32 %v4737_v4, %v6084_v26  ;;  %v1968_v43 = vpop.f32.mrf.mxu0 }
 0x15e   : > { %v1578_v2 = vpop.f32.mrf.mxu1 }
 0x15f   : > { %6728 = vst [vmem:[#allocation14_spill] sm:$0xff] %v6211_v47  ;;  %v6214_v49 = vadd.f32 %v4787_v19, %v1658_v57  ;;  %v1657_v21 = vadd.f32 %v1578_v2, %v6090_v63  ;;  %v4790_v48 = vpop.f32.mrf.mxu0 }
 0x160   : > { %v4740_v20 = vpop.f32.mrf.mxu1 }
 0x161   : > { %6729 = vst [vmem:[#allocation15_spill] sm:$0xff] %v6214_v49  ;;  %v6217_v62 = vadd.f32 %v1968_v43, %v1657_v21  ;;  %v1660_v33 = vadd.f32 %v4740_v20, %v6099_v36  ;;  %v1978_v53 = vpop.f32.mrf.mxu0 }
 0x162   : > { %v1588_v10 = vpop.f32.mrf.mxu1 }
 0x163   : > { %6730 = vst [vmem:[#allocation16_spill] sm:$0xff] %v6217_v62  ;;  %v6220_v34 = vadd.f32 %v4790_v48, %v1660_v33  ;;  %v1659_v39 = vadd.f32 %v1588_v10, %v6105_v50  ;;  %v4793_v26 = vpop.f32.mrf.mxu0 }
 0x164   : > { %v4743_v24 = vpop.f32.mrf.mxu1 }
 0x165   : > { %6731 = vst [vmem:[#allocation17_spill] sm:$0xff] %v6220_v34  ;;  %v6223_v58 = vadd.f32 %v1978_v53, %v1659_v39  ;;  %v1662_v15 = vadd.f32 %v4743_v24, %v6112_v45  ;;  %v1988_v63 = vpop.f32.mrf.mxu0 }
 0x166   : > { %v1598_v7 = vpop.f32.mrf.mxu1 }
 0x167   : > { %6732 = vst [vmem:[#allocation18_spill] sm:$0xff] %v6223_v58  ;;  %v6226_v56 = vadd.f32 %v4793_v26, %v1662_v15  ;;  %v1661_v41 = vadd.f32 %v1598_v7, %v6117_v31  ;;  %v4796_v36 = vpop.f32.mrf.mxu0 }
 0x168   : > { %v4746_v61 = vpop.f32.mrf.mxu1 }
 0x169   : > { %6733 = vst [vmem:[#allocation19_spill] sm:$0xff] %v6226_v56  ;;  %v6229_v37 = vadd.f32 %v1988_v63, %v1661_v41  ;;  %v1664_v22 = vadd.f32 %v4746_v61, %v6126_v0  ;;  %v1998_v50 = vpop.f32.mrf.mxu0 }
 0x16a   : > { %v1608_v12 = vpop.f32.mrf.mxu1 }
 0x16b   : > { %6734 = vst [vmem:[#allocation20_spill] sm:$0xff] %v6229_v37  ;;  %v6232_v29 = vadd.f32 %v4796_v36, %v1664_v22  ;;  %v1663_v59 = vadd.f32 %v1608_v12, %v6133_v5  ;;  %v4799_v45 = vpop.f32.mrf.mxu0 }
 0x16c   : > { %v4749_v13 = vpop.f32.mrf.mxu1 }
 0x16d   : > { %6735 = vst [vmem:[#allocation21_spill] sm:$0xff] %v6232_v29  ;;  %v6235_v16 = vadd.f32 %v1998_v50, %v1663_v59  ;;  %v1666_v25 = vadd.f32 %v4749_v13, %v6140_v35  ;;  %v2008_v31 = vpop.f32.mrf.mxu0 }
 0x16e   : > { %v1618_v40 = vpop.f32.mrf.mxu1 }
 0x16f   : > { %6736 = vst [vmem:[#allocation22_spill] sm:$0xff] %v6235_v16  ;;  %v6238_v6 = vadd.f32 %v4799_v45, %v1666_v25  ;;  %v1665_v4 = vadd.f32 %v1618_v40, %v6145_v3  ;;  %v4802_v0 = vpop.f32.mrf.mxu0 }
 0x170   : > { %v4752_v19 = vpop.f32.mrf.mxu1 }
 0x171   : > { %6737 = vst [vmem:[#allocation23_spill] sm:$0xff] %v6238_v6  ;;  %v6241_v57 = vadd.f32 %v2008_v31, %v1665_v4  ;;  %v1668_v2 = vadd.f32 %v4752_v19, %v6148_v9  ;;  %v2018_v5 = vpop.f32.mrf.mxu0 }
 0x172   : > { %v1628_v43 = vpop.f32.mrf.mxu1 }
 0x173   : > { %6738 = vst [vmem:[#allocation24_spill] sm:$0xff] %v6241_v57  ;;  %v6244_v21 = vadd.f32 %v4802_v0, %v1668_v2  ;;  %v1667_v20 = vadd.f32 %v1628_v43, %v6151_v18  ;;  %v6247_v35 = vpop.f32.mrf.mxu0 }
 0x174   : > { %v4807_v48 = vpop.f32.mrf.mxu1 }
 0x175   : > { %6739 = vst [vmem:[#allocation25_spill] sm:$0xff] %v6244_v21  ;;  %v6249_v33 = vadd.f32 %v2018_v5, %v1667_v20  ;;  %v6251_v53 = vpop.f32.mrf.mxu0 }
 0x176   : > { %v2258_v10 = vpop.f32.mrf.mxu1 }
 0x177   : > { %6740 = vst [vmem:[#allocation26_spill] sm:$0xff] %v6249_v33  ;;  %v6255_v39 = vpop.f32.mrf.mxu0 }
 0x178   : > { %v6253_v3 = vpop.f32.mrf.mxu1 }
 0x179   : > { %v6259_v9 = vpop.f32.mrf.mxu0 }
 0x17a   : > { %v6257_v24 = vpop.f32.mrf.mxu1 }
 0x17b   : > { %v6263_v15 = vpop.f32.mrf.mxu0 }
 0x17c   : > { %v6261_v26 = vpop.f32.mrf.mxu1 }
 0x17d   : > { %v6267_v7 = vpop.f32.mrf.mxu0 }
 0x17e   : > { %v6265_v18 = vpop.f32.mrf.mxu1 }
 0x17f   : > { %v6271_v41 = vpop.f32.mrf.mxu0 }
 0x180   : > { %v6269_v63 = vpop.f32.mrf.mxu1 }
 0x181   : > { %v6275_v36 = vpop.f32.mrf.mxu0 }
 0x182   : > { %v6273_v61 = vpop.f32.mrf.mxu1 }
 0x183   : > { %v6279_v12 = vpop.f32.mrf.mxu0 }
 0x184   : > { %v6277_v22 = vpop.f32.mrf.mxu1 }
 0x185   : > { %v6283_v59 = vpop.f32.mrf.mxu0 }
 0x186   : > { %v6281_v50 = vpop.f32.mrf.mxu1 }
 0x187   : > { %v6287_v45 = vpop.f32.mrf.mxu0 }
 0x188   : > { %v6285_v13 = vpop.f32.mrf.mxu1 }
 0x189   : > { %v6291_v40 = vpop.f32.mrf.mxu0 }
 0x18a   : > { %v6289_v25 = vpop.f32.mrf.mxu1 }
 0x18b   : > { %v6295_v4 = vpop.f32.mrf.mxu0 }
 0x18c   : > { %v6293_v31 = vpop.f32.mrf.mxu1 }
 0x18d   : > { %v6299_v0 = vpop.f32.mrf.mxu0 }
 0x18e   : > { %v6297_v19 = vpop.f32.mrf.mxu1 }
 0x18f   : > { %v6303_v43 = vpop.f32.mrf.mxu0 }
 0x190   : > { %v6301_v2 = vpop.f32.mrf.mxu1 }
 0x191   : > { %v6307_v20 = vpop.f32.mrf.mxu0 }
 0x192   : > { %v6305_v5 = vpop.f32.mrf.mxu1 }
 0x193   : > { %v6311_v21 = vpop.f32.mrf.mxu0 }
 0x194   : > { %v6309_v33 = vpop.f32.mrf.mxu1 }
 0x195   : > { %v6315_v6 = vpop.f32.mrf.mxu0 }
 0x196   : > { %v6313_v57 = vpop.f32.mrf.mxu1  ;;  %6741 = vst [vmem:[#allocation27_spill] sm:$0xff] %v6315_v6 }
 0x197   : > { %v6319_v29 = vpop.f32.mrf.mxu0 }
 0x198   : > { %v6317_v16 = vpop.f32.mrf.mxu1  ;;  %6743 = vst [vmem:[#allocation29_spill] sm:$0xff] %v6319_v29 }
 0x199   : > { %6742 = vst [vmem:[#allocation28_spill] sm:$0xff] %v6317_v16  ;;  %v6323_v56 = vpop.f32.mrf.mxu0 }
 0x19a   : > { %v6321_v37 = vpop.f32.mrf.mxu1  ;;  %6745 = vst [vmem:[#allocation32_spill] sm:$0xff] %v6323_v56 }
 0x19b   : > { %6744 = vst [vmem:[#allocation31_spill] sm:$0xff] %v6321_v37  ;;  %v6327_v34 = vpop.f32.mrf.mxu0 }
 0x19c   : > { %v6325_v58 = vpop.f32.mrf.mxu1  ;;  %6747 = vst [vmem:[#allocation3_spill] sm:$0xff] %v6327_v34 }
 0x19d   : > { %6746 = vst [vmem:[#allocation30_spill] sm:$0xff] %v6325_v58  ;;  %v6331_v49 = vpop.f32.mrf.mxu0 }
 0x19e   : > { %v6329_v62 = vpop.f32.mrf.mxu1  ;;  %6749 = vst [vmem:[#allocation5_spill] sm:$0xff] %v6331_v49 }
 0x19f   : > { %6748 = vst [vmem:[#allocation4_spill] sm:$0xff] %v6329_v62  ;;  %v6335_v52 = vpop.f32.mrf.mxu0 }
 0x1a0   : > { %v6333_v47 = vpop.f32.mrf.mxu1  ;;  %6751 = vst [vmem:[#allocation7_spill] sm:$0xff] %v6335_v52 }
 0x1a1   : > { %6750 = vst [vmem:[#allocation33_spill] sm:$0xff] %v6333_v47  ;;  %v6339_v16 = vpop.f32.mrf.mxu0 }
 0x1a2   : > { %v6337_v6 = vpop.f32.mrf.mxu1  ;;  %6753 = vst [vmem:[#allocation2_spill] sm:$0xff] %v6339_v16 }
 0x1a3   : > { %6752 = vst [vmem:[#allocation6_spill] sm:$0xff] %v6337_v6  ;;  %v6343_v37 = vpop.f32.mrf.mxu0 }
 0x1a4   : > { %v6341_v29 = vpop.f32.mrf.mxu1  ;;  %6755 = vst [vmem:[#allocation8_spill] sm:$0xff] %v6343_v37 }
 0x1a5   : > { %6754 = vst [vmem:[#allocation9_spill] sm:$0xff] %v6341_v29  ;;  %v6347_v58 = vpop.f32.mrf.mxu0 }
 0x1a6   : > { %v6345_v56 = vpop.f32.mrf.mxu1  ;;  %6757 = vst [vmem:[#allocation11_spill] sm:$0xff] %v6347_v58 }
 0x1a7   : > { %6756 = vst [vmem:[#allocation10_spill] sm:$0xff] %v6345_v56  ;;  %v6351_v62 = vpop.f32.mrf.mxu0  ;;  %v2418_v56 = vadd.f32 %v4807_v48, %v6154_v32  ;;  %v2419_v32 = vadd.f32 %v6257_v24, %v6163_v46 }
 0x1a8   : > { %v6349_v34 = vpop.f32.mrf.mxu1  ;;  %6759 = vst [vmem:[#allocation34_spill] sm:$0xff] %v6351_v62  ;;  %v2417_v62 = vadd.f32 %v2258_v10, %v6157_v11  ;;  %v2422_v11 = vadd.f32 %v6261_v26, %v6166_v28  ;;  %v6387_v10 = vld [vmem:[%s6579_s2] ss:$0 sm:$0xff] }
 0x1a9   : > { %6758 = vst [vmem:[#allocation12_spill] sm:$0xff] %v6349_v34  ;;  %v6355_v47 = vpop.f32.mrf.mxu0 }
 0x1aa   : > { %v6353_v49 = vpop.f32.mrf.mxu1  ;;  %6761 = vst [vmem:[#allocation36_spill] sm:$0xff] %v6355_v47 }
 0x1ab   : > { %6760 = vst [vmem:[#allocation35_spill] sm:$0xff] %v6353_v49  ;;  %v6359_v6 = vpop.f32.mrf.mxu0 }
 0x1ac   : > { %v6357_v52 = vpop.f32.mrf.mxu1  ;;  %6763 = vst [vmem:[#allocation38_spill] sm:$0xff] %v6359_v6  ;;  %v2420_v6 = vadd.f32 %v6253_v3, %v6160_v23 }
 0x1ad   : > { %6762 = vst [vmem:[#allocation37_spill] sm:$0xff] %v6357_v52  ;;  %v6363_v37 = vpop.f32.mrf.mxu0  ;;  %v2809_v52 = vadd.f32 %v6247_v35, %v2418_v56 }
 0x1ae   : > { %v6361_v16 = vpop.f32.mrf.mxu1  ;;  %6765 = vst [vmem:[#allocation40_spill] sm:$0xff] %v6363_v37  ;;  %v2808_v37 = vadd.f32 %v6251_v53, %v2417_v62  ;;  %v2811_v23 = vadd.f32 %v6255_v39, %v2420_v6  ;;  %v2421_v62 = vadd.f32 %v6265_v18, %v6169_v8  ;;  %v2424_v39 = vadd.f32 %v6269_v63, %v6172_v27 }
 0x1af   : > { %6764 = vst [vmem:[#allocation39_spill] sm:$0xff] %v6361_v16  ;;  %v6368_v34 = vpop.f32.mrf.mxu0 }
 0x1b0   : > { %v6366_v58 = vpop.f32.mrf.mxu1 }
 0x1b1   : > { %v6373_v47 = vpop.f32.mrf.mxu0 }
 0x1b2   : > { %v6371_v49 = vpop.f32.mrf.mxu1  ;;  %6766 = vst [vmem:[#allocation41_spill] sm:$0xff] %v6373_v47 }
 0x1b3   : > { %v4957_v29 = vpop.f32.mrf.mxu0 }
 0x1b4   : > { %v4907_v16 = vpop.f32.mrf.mxu1 }
 0x1b5   : > { %v3199_v48 = vadd.f32 %v4907_v16, %v2809_v52  ;;  %v3429_v35 = vpop.f32.mrf.mxu0  ;;  %v2810_v52 = vadd.f32 %v6259_v9, %v2419_v32  ;;  %v2812_v9 = vadd.f32 %v6267_v7, %v2421_v62 }
 0x1b6   : > { %v3039_v56 = vpop.f32.mrf.mxu1 }
 0x1b7   : > { %v3589_v3 = vadd.f32 %v4957_v29, %v3199_v48  ;;  %v3198_v47 = vadd.f32 %v3039_v56, %v2808_v37  ;;  %v4960_v28 = vpop.f32.mrf.mxu0  ;;  %v2813_v37 = vadd.f32 %v6263_v15, %v2422_v11  ;;  %v2426_v11 = vadd.f32 %v6277_v22, %v6178_v17 }
 0x1b8   : > { %v4910_v46 = vpop.f32.mrf.mxu1 }
 0x1b9   : > { %v3628_v16 = vadd.f32 %v6387_v10, %v3589_v3  ;;  %v3588_v6 = vadd.f32 %v3429_v35, %v3198_v47  ;;  %v3201_v29 = vadd.f32 %v4910_v46, %v2811_v23  ;;  %v3439_v8 = vpop.f32.mrf.mxu0  ;;  %v2423_v47 = vadd.f32 %v6273_v61, %v6175_v30 }
 0x1ba   : > { %v3049_v53 = vpop.f32.mrf.mxu1  ;;  %v2815_v23 = vadd.f32 %v6271_v41, %v2424_v39  ;;  %v2425_v3 = vadd.f32 %v6281_v50, %v6181_v55  ;;  %v2427_v39 = vadd.f32 %v6289_v25, %v6187_v51 }
 0x1bb   : > { %3661 = vst.msk [vmem:[%s6395_s13 + $0x8] sm:$0xff] %vm3659_vm2, %v3628_v16  ;;  %v3627_v24 = vadd.f32 %v6387_v10, %v3588_v6  ;;  %v3591_v26 = vadd.f32 %v4960_v28, %v3201_v29  ;;  %v3200_v18 = vadd.f32 %v3049_v53, %v2810_v52  ;;  %v4963_v48 = vpop.f32.mrf.mxu0  ;;  %v2814_v28 = vadd.f32 %v6275_v36, %v2423_v47 }
 0x1bc   : > { %v4913_v32 = vpop.f32.mrf.mxu1  ;;  %v2817_v52 = vadd.f32 %v6279_v12, %v2426_v11  ;;  %v2428_v29 = vadd.f32 %v6285_v13, %v6184_v14 }
 0x1bd   : > { %3660 = vst.msk [vmem:[%s6395_s13] sm:$0xff] %vm3659_vm2, %v3627_v24  ;;  %v3630_v15 = vadd.f32 %v6387_v10, %v3591_v26  ;;  %v3590_v27 = vadd.f32 %v3439_v8, %v3200_v18  ;;  %v3203_v63 = vadd.f32 %v4913_v32, %v2813_v37  ;;  %v3449_v35 = vpop.f32.mrf.mxu0  ;;  %v2816_v37 = vadd.f32 %v6283_v59, %v2425_v3 }
 0x1be   : > { %v3059_v56 = vpop.f32.mrf.mxu1  ;;  %v2430_v24 = vadd.f32 %v6293_v31, %v6190_v60  ;;  %v2429_v32 = vadd.f32 %v6297_v19, %v6193_v42 }
 0x1bf   : > { %3663 = vst.msk [vmem:[%s6395_s13 + $0x18] sm:$0xff] %vm3659_vm2, %v3630_v15  ;;  %v3629_v7 = vadd.f32 %v6387_v10, %v3590_v27  ;;  %v3593_v30 = vadd.f32 %v4963_v48, %v3203_v63  ;;  %v3202_v61 = vadd.f32 %v3059_v56, %v2812_v9  ;;  %v4966_v46 = vpop.f32.mrf.mxu0  ;;  %v2819_v9 = vadd.f32 %v6287_v45, %v2428_v29  ;;  %v6767_v29 = vld [vmem:[#allocation13_spill] sm:$0xff] }
 0x1c0   : > { %v4916_v62 = vpop.f32.mrf.mxu1  ;;  %v2818_v15 = vadd.f32 %v6291_v40, %v2427_v39  ;;  %v2821_v27 = vadd.f32 %v6295_v4, %v2430_v24  ;;  %v2432_v56 = vadd.f32 %v6301_v2, %v6196_v1  ;;  %v6770_v39 = vld [vmem:[#allocation14_spill] sm:$0xff] }
 0x1c1   : > { %3662 = vst.msk [vmem:[%s6395_s13 + $0x10] sm:$0xff] %vm3659_vm2, %v3629_v7  ;;  %v3632_v17 = vadd.f32 %v6387_v10, %v3593_v30  ;;  %v3592_v41 = vadd.f32 %v3449_v35, %v3202_v61  ;;  %v3205_v22 = vadd.f32 %v4916_v62, %v2815_v23  ;;  %v3459_v6 = vpop.f32.mrf.mxu0  ;;  %v2820_v35 = vadd.f32 %v6299_v0, %v2429_v32 }
 0x1c2   : > { %v3069_v16 = vpop.f32.mrf.mxu1  ;;  %v2431_v30 = vadd.f32 %v6305_v5, %v6199_v38  ;;  %v2434_v61 = vadd.f32 %v6309_v33, %v6202_v54 }
 0x1c3   : > { %3665 = vst.msk [vmem:[%s6395_s13 + $0x28] sm:$0xff] %vm3659_vm2, %v3632_v17  ;;  %v3631_v55 = vadd.f32 %v6387_v10, %v3592_v41  ;;  %v3595_v36 = vadd.f32 %v4966_v46, %v3205_v22  ;;  %v3204_v50 = vadd.f32 %v3069_v16, %v2814_v28  ;;  %v4969_v8 = vpop.f32.mrf.mxu0  ;;  %v2823_v46 = vadd.f32 %v6303_v43, %v2432_v56 }
 0x1c4   : > { %v4919_v53 = vpop.f32.mrf.mxu1  ;;  %v2433_v28 = vadd.f32 %v6313_v57, %v6205_v44  ;;  %v2822_v22 = vadd.f32 %v6307_v20, %v2431_v30 }
 0x1c5   : > { %3664 = vst.msk [vmem:[%s6395_s13 + $0x20] sm:$0xff] %vm3659_vm2, %v3631_v55  ;;  %v3634_v12 = vadd.f32 %v6387_v10, %v3595_v36  ;;  %v3594_v14 = vadd.f32 %v3459_v6, %v3204_v50  ;;  %v3207_v13 = vadd.f32 %v4919_v53, %v2817_v52  ;;  %v3469_v18 = vpop.f32.mrf.mxu0  ;;  %v2825_v52 = vadd.f32 %v6311_v21, %v2434_v61  ;;  %v6768_v55 = vld [vmem:[#allocation28_spill] sm:$0xff]  ;;  %v6769_v50 = vld [vmem:[#allocation27_spill] sm:$0xff] }
 0x1c6   : > { %v3079_v26 = vpop.f32.mrf.mxu1  ;;  %v2436_v36 = vadd.f32 %v6768_v55, %v6767_v29  ;;  %v6786_v55 = vld [vmem:[#allocation7_spill] sm:$0xff] }
 0x1c7   : > { %3667 = vst.msk [vmem:[%s6395_s13 + $0x38] sm:$0xff] %vm3659_vm2, %v3634_v12  ;;  %v3633_v59 = vadd.f32 %v6387_v10, %v3594_v14  ;;  %v3597_v51 = vadd.f32 %v4969_v8, %v3207_v13  ;;  %v3206_v25 = vadd.f32 %v3079_v26, %v2816_v37  ;;  %v4972_v47 = vpop.f32.mrf.mxu0  ;;  %v2824_v37 = vadd.f32 %v6769_v50, %v2433_v28  ;;  %v6771_v12 = vld [vmem:[#allocation31_spill] sm:$0xff]  ;;  %v6782_v28 = vld [vmem:[#allocation18_spill] sm:$0xff]  ;;  %v6787_v50 = vld [vmem:[#allocation20_spill] sm:$0xff] }
 0x1c8   : > { %v4922_v48 = vpop.f32.mrf.mxu1  ;;  %v2435_v14 = vadd.f32 %v6771_v12, %v6770_v39  ;;  %v6772_v26 = vld [vmem:[#allocation15_spill] sm:$0xff]  ;;  %v6789_v12 = vld [vmem:[#allocation2_spill] sm:$0xff] }
 0x1c9   : > { %3666 = vst.msk [vmem:[%s6395_s13 + $0x30] sm:$0xff] %vm3659_vm2, %v3633_v59  ;;  %v3636_v60 = vadd.f32 %v6387_v10, %v3597_v51  ;;  %v3596_v45 = vadd.f32 %v3469_v18, %v3206_v25  ;;  %v3209_v31 = vadd.f32 %v4922_v48, %v2819_v9  ;;  %v3479_v11 = vpop.f32.mrf.mxu0  ;;  %v6773_v18 = vld [vmem:[#allocation30_spill] sm:$0xff]  ;;  %v6774_v25 = vld [vmem:[#allocation29_spill] sm:$0xff] }
 0x1ca   : > { %v3089_v63 = vpop.f32.mrf.mxu1  ;;  %v2438_v9 = vadd.f32 %v6773_v18, %v6772_v26  ;;  %v2827_v32 = vadd.f32 %v6774_v25, %v2436_v36  ;;  %v6790_v26 = vld [vmem:[#allocation8_spill] sm:$0xff] }
 0x1cb   : > { %3669 = vst.msk [vmem:[%s6395_s13 + $0x48] sm:$0xff] %vm3659_vm2, %v3636_v60  ;;  %v3635_v42 = vadd.f32 %v6387_v10, %v3596_v45  ;;  %v3599_v40 = vadd.f32 %v4972_v47, %v3209_v31  ;;  %v3208_v19 = vadd.f32 %v3089_v63, %v2818_v15  ;;  %v4975_v7 = vpop.f32.mrf.mxu0  ;;  %v6775_v60 = vld [vmem:[#allocation16_spill] sm:$0xff] }
 0x1cc   : > { %v4925_v23 = vpop.f32.mrf.mxu1  ;;  %v6776_v45 = vld [vmem:[#allocation4_spill] sm:$0xff] }
 0x1cd   : > { %3668 = vst.msk [vmem:[%s6395_s13 + $0x40] sm:$0xff] %vm3659_vm2, %v3635_v42  ;;  %v3638_v4 = vadd.f32 %v6387_v10, %v3599_v40  ;;  %v3598_v1 = vadd.f32 %v3479_v11, %v3208_v19  ;;  %v3211_v2 = vadd.f32 %v4925_v23, %v2821_v27  ;;  %v3489_v62 = vpop.f32.mrf.mxu0  ;;  %v2437_v31 = vadd.f32 %v6776_v45, %v6775_v60  ;;  %v6777_v11 = vld [vmem:[#allocation32_spill] sm:$0xff]  ;;  %v6793_v60 = vld [vmem:[#allocation11_spill] sm:$0xff] }
 0x1ce   : > { %v3099_v3 = vpop.f32.mrf.mxu1  ;;  %v2826_v56 = vadd.f32 %v6777_v11, %v2435_v14  ;;  %v6792_v25 = vld [vmem:[#allocation12_spill] sm:$0xff]  ;;  %v6795_v11 = vld [vmem:[#allocation35_spill] sm:$0xff] }
 0x1cf   : > { %3671 = vst.msk [vmem:[%s6395_s13 + $0x58] sm:$0xff] %vm3659_vm2, %v3638_v4  ;;  %v3637_v0 = vadd.f32 %v6387_v10, %v3598_v1  ;;  %v3601_v38 = vadd.f32 %v4975_v7, %v3211_v2  ;;  %v3210_v5 = vadd.f32 %v3099_v3, %v2820_v35  ;;  %v4978_v41 = vpop.f32.mrf.mxu0  ;;  %v6778_v35 = vld [vmem:[#allocation3_spill] sm:$0xff]  ;;  %v6779_v4 = vld [vmem:[#allocation17_spill] sm:$0xff] }
 0x1d0   : > { %v4928_v17 = vpop.f32.mrf.mxu1  ;;  %v2829_v23 = vadd.f32 %v6778_v35, %v2438_v9  ;;  %v6780_v1 = vld [vmem:[#allocation33_spill] sm:$0xff]  ;;  %v6796_v35 = vld [vmem:[#allocation23_spill] sm:$0xff] }
 0x1d1   : > { %3670 = vst.msk [vmem:[%s6395_s13 + $0x50] sm:$0xff] %vm3659_vm2, %v3637_v0  ;;  %v3640_v54 = vadd.f32 %v6387_v10, %v3601_v38  ;;  %v3600_v33 = vadd.f32 %v3489_v62, %v3210_v5  ;;  %v3213_v43 = vadd.f32 %v4928_v17, %v2823_v46  ;;  %v3499_v6 = vpop.f32.mrf.mxu0  ;;  %v2440_v2 = vadd.f32 %v6780_v1, %v6779_v4  ;;  %v6781_v46 = vld [vmem:[#allocation5_spill] sm:$0xff]  ;;  %v6783_v17 = vld [vmem:[#allocation6_spill] sm:$0xff] }
 0x1d2   : > { %v3109_v16 = vpop.f32.mrf.mxu1  ;;  %v2828_v0 = vadd.f32 %v6781_v46, %v2437_v31  ;;  %v6798_v1 = vld [vmem:[#allocation34_spill] sm:$0xff]  ;;  %v6799_v46 = vld [vmem:[#allocation24_spill] sm:$0xff] }
 0x1d3   : > { %3673 = vst.msk [vmem:[%s6395_s13 + $0x68] sm:$0xff] %vm3659_vm2, %v3640_v54  ;;  %v3639_v44 = vadd.f32 %v6387_v10, %v3600_v33  ;;  %v3603_v57 = vadd.f32 %v4978_v41, %v3213_v43  ;;  %v3212_v20 = vadd.f32 %v3109_v16, %v2822_v22  ;;  %v4981_v8 = vpop.f32.mrf.mxu0  ;;  %v2439_v41 = vadd.f32 %v6783_v17, %v6782_v28  ;;  %v6784_v43 = vld [vmem:[#allocation19_spill] sm:$0xff]  ;;  %v6801_v17 = vld [vmem:[#allocation36_spill] sm:$0xff] }
 0x1d4   : > { %v4931_v53 = vpop.f32.mrf.mxu1  ;;  %v2831_v36 = vadd.f32 %v6786_v55, %v2440_v2 }
 0x1d5   : > { %3672 = vst.msk [vmem:[%s6395_s13 + $0x60] sm:$0xff] %vm3659_vm2, %v3639_v44  ;;  %v3642_v21 = vadd.f32 %v6387_v10, %v3603_v57  ;;  %v3602_v13 = vadd.f32 %v3499_v6, %v3212_v20  ;;  %v3215_v24 = vadd.f32 %v4931_v53, %v2825_v52  ;;  %v3509_v51 = vpop.f32.mrf.mxu0  ;;  %v6785_v52 = vld [vmem:[#allocation9_spill] sm:$0xff]  ;;  %v2830_v14 = vadd.f32 %v6789_v12, %v2439_v41 }
 0x1d6   : > { %v3119_v59 = vpop.f32.mrf.mxu1  ;;  %v2442_v16 = vadd.f32 %v6785_v52, %v6784_v43  ;;  %v6802_v43 = vld [vmem:[#allocation38_spill] sm:$0xff] }
 0x1d7   : > { %3675 = vst.msk [vmem:[%s6395_s13 + $0x78] sm:$0xff] %vm3659_vm2, %v3642_v21  ;;  %v3641_v48 = vadd.f32 %v6387_v10, %v3602_v13  ;;  %v3605_v47 = vadd.f32 %v4981_v8, %v3215_v24  ;;  %v3214_v15 = vadd.f32 %v3119_v59, %v2824_v37  ;;  %v4984_v63 = vpop.f32.mrf.mxu0  ;;  %v6788_v37 = vld [vmem:[#allocation10_spill] sm:$0xff] }
 0x1d8   : > { %v4934_v27 = vpop.f32.mrf.mxu1  ;;  %v2441_v53 = vadd.f32 %v6788_v37, %v6787_v50  ;;  %v2833_v18 = vadd.f32 %v6790_v26, %v2442_v16 }
 0x1d9   : > { %3674 = vst.msk [vmem:[%s6395_s13 + $0x70] sm:$0xff] %vm3659_vm2, %v3641_v48  ;;  %v3644_v42 = vadd.f32 %v6387_v10, %v3605_v47  ;;  %v3604_v40 = vadd.f32 %v3509_v51, %v3214_v15  ;;  %v3217_v19 = vadd.f32 %v4934_v27, %v2827_v32  ;;  %v3519_v30 = vpop.f32.mrf.mxu0  ;;  %v6791_v51 = vld [vmem:[#allocation21_spill] sm:$0xff] }
 0x1da   : > { %v3129_v7 = vpop.f32.mrf.mxu1  ;;  %v2444_v32 = vadd.f32 %v6792_v25, %v6791_v51  ;;  %v2832_v45 = vadd.f32 %v6793_v60, %v2441_v53  ;;  %v6806_v51 = vld [vmem:[#allocation41_spill] sm:$0xff] }
 0x1db   : > { %3677 = vst.msk [vmem:[%s6395_s13 + $0x88] sm:$0xff] %vm3659_vm2, %v3644_v42  ;;  %v3643_v61 = vadd.f32 %v6387_v10, %v3604_v40  ;;  %v3607_v3 = vadd.f32 %v4984_v63, %v3217_v19  ;;  %v3216_v62 = vadd.f32 %v3129_v7, %v2826_v56  ;;  %v4987_v5 = vpop.f32.mrf.mxu0  ;;  %v6794_v63 = vld [vmem:[#allocation22_spill] sm:$0xff] }
 0x1dc   : > { %v4937_v38 = vpop.f32.mrf.mxu1  ;;  %v2443_v56 = vadd.f32 %v6795_v11, %v6794_v63  ;;  %v2835_v2 = vadd.f32 %v6798_v1, %v2444_v32 }
 0x1dd   : > { %3676 = vst.msk [vmem:[%s6395_s13 + $0x80] sm:$0xff] %vm3659_vm2, %v3643_v61  ;;  %v3646_v22 = vadd.f32 %v6387_v10, %v3607_v3  ;;  %v3606_v54 = vadd.f32 %v3519_v30, %v3216_v62  ;;  %v3219_v33 = vadd.f32 %v4937_v38, %v2829_v23  ;;  %v3529_v29 = vpop.f32.mrf.mxu0  ;;  %v6797_v23 = vld [vmem:[#allocation37_spill] sm:$0xff] }
 0x1de   : > { %v3139_v6 = vpop.f32.mrf.mxu1  ;;  %v2446_v7 = vadd.f32 %v6797_v23, %v6796_v35  ;;  %v2834_v41 = vadd.f32 %v6801_v17, %v2443_v56 }
 0x1df   : > { %3679 = vst.msk [vmem:[%s6395_s13 + $0x98] sm:$0xff] %vm3659_vm2, %v3646_v22  ;;  %v3645_v44 = vadd.f32 %v6387_v10, %v3606_v54  ;;  %v3609_v57 = vadd.f32 %v4987_v5, %v3219_v33  ;;  %v3218_v20 = vadd.f32 %v3139_v6, %v2828_v0  ;;  %v4990_v39 = vpop.f32.mrf.mxu0  ;;  %v6800_v0 = vld [vmem:[#allocation39_spill] sm:$0xff] }
 0x1e0   : > { %v4940_v8 = vpop.f32.mrf.mxu1  ;;  %v2445_v38 = vadd.f32 %v6800_v0, %v6799_v46  ;;  %v2837_v52 = vadd.f32 %v6802_v43, %v2446_v7 }
 0x1e1   : > { %3678 = vst.msk [vmem:[%s6395_s13 + $0x90] sm:$0xff] %vm3659_vm2, %v3645_v44  ;;  %v3648_v21 = vadd.f32 %v6387_v10, %v3609_v57  ;;  %v3608_v13 = vadd.f32 %v3529_v29, %v3218_v20  ;;  %v3221_v24 = vadd.f32 %v4940_v8, %v2831_v36  ;;  %v3539_v59 = vpop.f32.mrf.mxu0  ;;  %v6803_v29 = vld [vmem:[#allocation25_spill] sm:$0xff]  ;;  %v6804_v20 = vld [vmem:[#allocation40_spill] sm:$0xff]  ;;  %v6805_v8 = vld [vmem:[#allocation26_spill] sm:$0xff] }
 0x1e2   : > { %v3149_v9 = vpop.f32.mrf.mxu1  ;;  %v2448_v55 = vadd.f32 %v6366_v58, %v6803_v29  ;;  %v2836_v50 = vadd.f32 %v6804_v20, %v2445_v38 }
 0x1e3   : > { %3681 = vst.msk [vmem:[%s6395_s13 + $0xa8] sm:$0xff] %vm3659_vm2, %v3648_v21  ;;  %v3647_v48 = vadd.f32 %v6387_v10, %v3608_v13  ;;  %v3611_v47 = vadd.f32 %v4990_v39, %v3221_v24  ;;  %v3220_v15 = vadd.f32 %v3149_v9, %v2830_v14  ;;  %v4993_v27 = vpop.f32.mrf.mxu0  ;;  %v2447_v39 = vadd.f32 %v6371_v49, %v6805_v8 }
 0x1e4   : > { %v4943_v31 = vpop.f32.mrf.mxu1  ;;  %v2839_v24 = vadd.f32 %v6368_v34, %v2448_v55 }
 0x1e5   : > { %3680 = vst.msk [vmem:[%s6395_s13 + $0xa0] sm:$0xff] %vm3659_vm2, %v3647_v48  ;;  %v3650_v42 = vadd.f32 %v6387_v10, %v3611_v47  ;;  %v3610_v40 = vadd.f32 %v3539_v59, %v3220_v15  ;;  %v3223_v19 = vadd.f32 %v4943_v31, %v2833_v18  ;;  %v3549_v4 = vpop.f32.mrf.mxu0  ;;  %v2838_v25 = vadd.f32 %v6806_v51, %v2447_v39 }
 0x1e6   : > { %v3159_v30 = vpop.f32.mrf.mxu1 }
 0x1e7   : > { %3683 = vst.msk [vmem:[%s6395_s13 + $0xb8] sm:$0xff] %vm3659_vm2, %v3650_v42  ;;  %v3649_v61 = vadd.f32 %v6387_v10, %v3610_v40  ;;  %v3613_v3 = vadd.f32 %v4993_v27, %v3223_v19  ;;  %v3222_v62 = vadd.f32 %v3159_v30, %v2832_v45  ;;  %v4996_v28 = vpop.f32.mrf.mxu0 }
 0x1e8   : > { %v4946_v5 = vpop.f32.mrf.mxu1 }
 0x1e9   : > { %3682 = vst.msk [vmem:[%s6395_s13 + $0xb0] sm:$0xff] %vm3659_vm2, %v3649_v61  ;;  %v3652_v22 = vadd.f32 %v6387_v10, %v3613_v3  ;;  %v3612_v54 = vadd.f32 %v3549_v4, %v3222_v62  ;;  %v3225_v33 = vadd.f32 %v4946_v5, %v2835_v2  ;;  %v3559_v6 = vpop.f32.mrf.mxu0 }
 0x1ea   : > { %v3169_v16 = vpop.f32.mrf.mxu1 }
 0x1eb   : > { %3685 = vst.msk [vmem:[%s6395_s13 + $0xc8] sm:$0xff] %vm3659_vm2, %v3652_v22  ;;  %v3651_v36 = vadd.f32 %v6387_v10, %v3612_v54  ;;  %v3615_v44 = vadd.f32 %v4996_v28, %v3225_v33  ;;  %v3224_v57 = vadd.f32 %v3169_v16, %v2834_v41  ;;  %v4999_v53 = vpop.f32.mrf.mxu0 }
 0x1ec   : > { %v4949_v37 = vpop.f32.mrf.mxu1 }
 0x1ed   : > { %3684 = vst.msk [vmem:[%s6395_s13 + $0xc0] sm:$0xff] %vm3659_vm2, %v3651_v36  ;;  %v3654_v12 = vadd.f32 %v6387_v10, %v3615_v44  ;;  %v3614_v58 = vadd.f32 %v3559_v6, %v3224_v57  ;;  %v3227_v14 = vadd.f32 %v4949_v37, %v2837_v52  ;;  %v3569_v13 = vpop.f32.mrf.mxu0 }
 0x1ee   : > { %v3179_v21 = vpop.f32.mrf.mxu1 }
 0x1ef   : > { %3687 = vst.msk [vmem:[%s6395_s13 + $0xd8] sm:$0xff] %vm3659_vm2, %v3654_v12  ;;  %v3653_v26 = vadd.f32 %v6387_v10, %v3614_v58  ;;  %v3617_v18 = vadd.f32 %v4999_v53, %v3227_v14  ;;  %v3226_v9 = vadd.f32 %v3179_v21, %v2836_v50  ;;  %v5002_v49 = vpop.f32.mrf.mxu0 }
 0x1f0   : > { %v4952_v59 = vpop.f32.mrf.mxu1 }
 0x1f1   : > { %3686 = vst.msk [vmem:[%s6395_s13 + $0xd0] sm:$0xff] %vm3659_vm2, %v3653_v26  ;;  %v3656_v32 = vadd.f32 %v6387_v10, %v3617_v18  ;;  %v3616_v48 = vadd.f32 %v3569_v13, %v3226_v9  ;;  %v3229_v47 = vadd.f32 %v4952_v59, %v2839_v24  ;;  %v3579_v31 = vpop.f32.mrf.mxu0 }
 0x1f2   : > { %v3189_v34 = vpop.f32.mrf.mxu1 }
 0x1f3   : > { %3689 = vst.msk [vmem:[%s6395_s13 + $0xe8] sm:$0xff] %vm3659_vm2, %v3656_v32  ;;  %v3655_v15 = vadd.f32 %v6387_v10, %v3616_v48  ;;  %v3619_v60 = vadd.f32 %v5002_v49, %v3229_v47  ;;  %v3228_v45 = vadd.f32 %v3189_v34, %v2838_v25 }
 0x1f5   : > { %3688 = vst.msk [vmem:[%s6395_s13 + $0xe0] sm:$0xff] %vm3659_vm2, %v3655_v15  ;;  %v3658_v27 = vadd.f32 %v6387_v10, %v3619_v60  ;;  %v3618_v63 = vadd.f32 %v3579_v31, %v3228_v45 }
 0x1f7   : > { %3691 = vst.msk [vmem:[%s6395_s13 + $0xf8] sm:$0xff] %vm3659_vm2, %v3658_v27  ;;  %v3657_v11 = vadd.f32 %v6387_v10, %v3618_v63 }
 0x1f9   : > { %3690 = vst.msk [vmem:[%s6395_s13 + $0xf0] sm:$0xff] %vm3659_vm2, %v3657_v11 }
 0x1fa PF: > { %s13_s12 = sadd.s32 1, %s5020_s12  }
 0x1fb   : > { %p10_p4 = scmp.ge.s32.totalorder %s13_s12, 4  }
 0x1fd   :  { %12 = sbr.rel (!%p10_p4) target bundleno = 1 (0x1), region = 72 }

</bundles_post_ra>
